<compile_context>
chip_gen: v6e
topology: v6e:2x2x1
jax: 0.10.0
libtpu: 0.0.40
codegen_flags: <defaults>
</compile_context>

<pallas_src>
import jax
import jax.numpy as jnp
import numpy as np
from jax.experimental import pallas as pl
from jax.experimental.pallas import tpu as pltpu

INPUT_DIM = 9
SEQ_LEN = 10
NUM_CLASSES = 2
OUT_PAD = 128          # lane-dense padded logits width
BN_EPS = 1e-5
ALIGN = 16             # bf16 sublane packing: keep batch blocks 16-aligned


def _round_up(n, m):
    return ((n + m - 1) // m) * m


# ----------------------------------------------------------------------------
# Pallas kernel: full forward pass for one batch block.
# ----------------------------------------------------------------------------
def obfs_kernel(
    x_ref,                                   # (10, BB, 9)  f32 length-major input
    w1l_ref, w1m_ref, w1r_ref, t1_ref,       # 3x (9, 64) bf16, (1, 64) f32   BN-folded
    w2_ref, t2_ref,                          # (192, 128) bf16, (1, 128) f32  BN-folded
    w3_ref, t3_ref,                          # (384, 256) bf16, (1, 256) f32  BN-folded
    fc1w0_ref, fc1w1_ref, fc1b_ref,          # (256,128) bf16 x2, (1,128) f32
    fc2w_ref, fc2b_ref,                      # (128,128) bf16 padded, (1,128) f32 padded
    out_ref,                                 # (BB, 128) bf16
):
    L1, bb, cin = x_ref.shape

    def mm(a, w_ref):
        # bf16 x bf16 on the MXU, f32 accumulate.
        return jnp.dot(a.astype(jnp.bfloat16), w_ref[...],
                       preferred_element_type=jnp.float32)

    def shift_relu(y, t_ref):
        # folded (conv bias + eval-mode BatchNorm) shift, then ReLU (f32 VPU).
        return jnp.maximum(y + t_ref[...], 0.0)

    def maxpool2(h):
        # MaxPool1d(kernel=2, stride=2), floor semantics, over the leading
        # length axis: one aligned-slab VPU max, no stack/concat temporaries.
        L, b, C = h.shape
        lo = L // 2
        h4 = h[: 2 * lo].reshape(lo, 2, b, C)
        return jnp.maximum(h4[:, 0], h4[:, 1])              # (lo, b, C)

    def conv_taps(h):
        # (L, b, C) f32 -> (L*b, 3*C) bf16: taps [x[l-1], x[l], x[l+1]] on lanes.
        L, b, C = h.shape
        hb = h.astype(jnp.bfloat16)
        z = jnp.zeros((1, b, C), jnp.bfloat16)
        hp = jnp.concatenate([z, hb, z], axis=0)             # (L+2, b, C)
        left = hp[:L].reshape(L * b, C)
        mid = hb.reshape(L * b, C)
        right = hp[2:].reshape(L * b, C)
        return jnp.concatenate([left, mid, right], axis=-1)

    # conv1 + BN + ReLU: three accumulating K=9 matmuls over shifted length
    # slices (raw 9-wide input; no 3x tap duplication over HBM) -> pool.
    x = x_ref[...].astype(jnp.bfloat16)                      # (10, BB, 9)
    zpad = jnp.zeros((1, bb, cin), jnp.bfloat16)
    xp = jnp.concatenate([zpad, x, zpad], axis=0)            # (12, BB, 9)
    left = xp[:L1].reshape(L1 * bb, cin)
    mid = x.reshape(L1 * bb, cin)
    right = xp[2:].reshape(L1 * bb, cin)
    c1 = w1m_ref.shape[1]
    y = mm(left, w1l_ref) + mm(mid, w1m_ref) + mm(right, w1r_ref)
    h = maxpool2(shift_relu(y, t1_ref).reshape(L1, bb, c1))  # (5, BB, 64)

    # conv2 + BN + ReLU -> pool (taps stacked on lanes, one K=192 matmul)
    L2, c2 = h.shape[0], w2_ref.shape[1]
    h = shift_relu(mm(conv_taps(h), w2_ref), t2_ref)
    h = maxpool2(h.reshape(L2, bb, c2))                      # (2, BB, 128)

    # conv3 + BN + ReLU (one K=384 matmul)
    L3, c3 = h.shape[0], w3_ref.shape[1]
    h = shift_relu(mm(conv_taps(h), w3_ref), t3_ref)
    h = h.reshape(L3, bb, c3)                                # (2, BB, 256)

    # classifier: Flatten -> Linear(512,128) -> ReLU -> Dropout -> Linear(128,2)
    # Flatten replaced by per-position split fc1 weights (no lane concat).
    # TODO(synk): nn.Dropout(0.3) is identity in inference mode (no RNG mask).
    zf = jnp.maximum(mm(h[0], fc1w0_ref) + mm(h[1], fc1w1_ref) + fc1b_ref[...], 0.0)
    logits = mm(zf, fc2w_ref) + fc2b_ref[...]                # (BB, 128) f32
    out_ref[...] = logits.astype(out_ref.dtype)              # bf16 lane-dense store


# ----------------------------------------------------------------------------
# Wrapper: layout plumbing (length-major, padding) + pallas_call.
# ----------------------------------------------------------------------------
def obfs_forward(x, kp, *, block_b=512):
    # block_b=512 is a generation-safe default (fits v7x's 64 MiB/TC VMEM with
    # margin); on v5e/v6e it can be raised to 1024-2048 with vmem_limit ~96 MiB.
    B, L, Cin = x.shape
    Ba = _round_up(B, ALIGN)
    bb = max(ALIGN, min(_round_up(block_b, ALIGN), Ba))
    # v7x megacore: the "parallel" batch axis needs >= 2 blocks to use both TCs.
    if Ba >= 2 * ALIGN and Ba // bb < 2:
        bb = _round_up(Ba // 2, ALIGN)
    Bp = _round_up(B, bb)
    if Bp != B:
        x = jnp.concatenate([x, jnp.zeros((Bp - B, L, Cin), x.dtype)], axis=0)
    x_lm = jnp.transpose(x, (1, 0, 2))                       # (L, Bp, Cin) length-major

    weights = (kp["w1l"], kp["w1m"], kp["w1r"], kp["t1"],
               kp["w2"], kp["t2"], kp["w3"], kp["t3"],
               kp["fc1_w0"], kp["fc1_w1"], kp["fc1_b"], kp["fc2_w"], kp["fc2_b"])

    def resident(a):
        # Full-array block + constant index_map: DMA'd once, stays VMEM-resident.
        # (bf16 weights total ~0.4 MiB, so default double-buffering is harmless.)
        return pl.BlockSpec(a.shape, lambda i, _n=a.ndim: (0,) * _n)

    out = pl.pallas_call(
        obfs_kernel,
        out_shape=jax.ShapeDtypeStruct((Bp, OUT_PAD), jnp.bfloat16),
        grid=(Bp // bb,),
        in_specs=[pl.BlockSpec((L, bb, Cin), lambda i: (0, i, 0))]
                 + [resident(a) for a in weights],
        out_specs=pl.BlockSpec((bb, OUT_PAD), lambda i: (i, 0)),
        compiler_params=pltpu.CompilerParams(
            dimension_semantics=("parallel",),
            vmem_limit_bytes=48 * 1024 * 1024),
    )(x_lm, *weights)
    return out[:B, :NUM_CLASSES].astype(jnp.float32)


# ----------------------------------------------------------------------------
# Parameter construction (PyTorch layouts) and kernel-layout conversion.
# ----------------------------------------------------------------------------
def make_pt_params(key):
    """Deterministic parameters in PyTorch layouts (shapes from __init__)."""
    ks = jax.random.split(key, 32)
    ki = iter(ks)

    def conv_block(cin, cout):
        w = jax.random.normal(next(ki), (cout, cin, 3), jnp.float32) / np.sqrt(3 * cin)
        b = jax.random.normal(next(ki), (cout,), jnp.float32) * 0.05
        gamma = jax.random.uniform(next(ki), (cout,), jnp.float32, 0.5, 1.5)
        beta = jax.random.normal(next(ki), (cout,), jnp.float32) * 0.1
        mean = jax.random.normal(next(ki), (cout,), jnp.float32) * 0.1
        var = jax.random.uniform(next(ki), (cout,), jnp.float32, 0.5, 1.5)
        return dict(w=w, b=b, gamma=gamma, beta=beta, mean=mean, var=var)

    return {
        "c1": conv_block(INPUT_DIM, 64),
        "c2": conv_block(64, 128),
        "c3": conv_block(128, 256),
        "fc1_w": jax.random.normal(next(ki), (128, 512), jnp.float32) / np.sqrt(512),
        "fc1_b": jax.random.normal(next(ki), (128,), jnp.float32) * 0.05,
        "fc2_w": jax.random.normal(next(ki), (NUM_CLASSES, 128), jnp.float32) / np.sqrt(128),
        "fc2_b": jax.random.normal(next(ki), (NUM_CLASSES,), jnp.float32) * 0.05,
    }


def to_kernel_params(pt):
    """PyTorch layout -> kernel layout (BN folded, bf16 weights, fc1 split, fc2 padded)."""
    kp = {}
    for i, name in enumerate(["c1", "c2", "c3"], start=1):
        blk = pt[name]
        s = blk["gamma"] / jnp.sqrt(blk["var"] + BN_EPS)            # (Cout,)
        wf = blk["w"] * s[:, None, None]                            # (Cout, Cin, 3)
        cout, cin, _ = blk["w"].shape
        # tap-major [x[l-1] | x[l] | x[l+1]], matching the kernel's tap order
        w_taps = jnp.transpose(wf, (2, 1, 0))                       # (3, Cin, Cout)
        if i == 1:
            kp["w1l"] = w_taps[0].astype(jnp.bfloat16)              # (9, 64)
            kp["w1m"] = w_taps[1].astype(jnp.bfloat16)
            kp["w1r"] = w_taps[2].astype(jnp.bfloat16)
        else:
            kp[f"w{i}"] = w_taps.reshape(3 * cin, cout).astype(jnp.bfloat16)
        kp[f"t{i}"] = (blk["beta"] + (blk["b"] - blk["mean"]) * s)[None, :]

    hid, flat = pt["fc1_w"].shape                                   # (128, 512)
    c3 = flat // 2
    fc1_split = pt["fc1_w"].reshape(hid, c3, 2)                     # PyTorch flatten: c*2+l
    kp["fc1_w0"] = jnp.transpose(fc1_split[:, :, 0]).astype(jnp.bfloat16)  # (256, 128)
    kp["fc1_w1"] = jnp.transpose(fc1_split[:, :, 1]).astype(jnp.bfloat16)  # (256, 128)
    kp["fc1_b"] = pt["fc1_b"][None, :]
    kp["fc2_w"] = (jnp.zeros((hid, OUT_PAD), jnp.float32)
                   .at[:, :NUM_CLASSES].set(pt["fc2_w"].T)).astype(jnp.bfloat16)
    kp["fc2_b"] = jnp.zeros((1, OUT_PAD), jnp.float32).at[0, :NUM_CLASSES].set(pt["fc2_b"])
    return kp


# ----------------------------------------------------------------------------
# Pure-JAX f32 reference matching PyTorch semantics (NCL conv, eval BN/dropout).
# ----------------------------------------------------------------------------
def reference_forward(x, pt):
    h = jnp.transpose(x, (0, 2, 1))  # (B, C, L) == x.permute(0, 2, 1)

    def block(h, blk):
        y = jax.lax.conv_general_dilated(
            h, blk["w"], window_strides=(1,), padding=((1, 1),),
            dimension_numbers=("NCH", "OIH", "NCH"),
        )
        y = y + blk["b"][None, :, None]
        y = (y - blk["mean"][None, :, None]) / jnp.sqrt(blk["var"][None, :, None] + BN_EPS)
        y = y * blk["gamma"][None, :, None] + blk["beta"][None, :, None]
        return jnp.maximum(y, 0.0)

    def maxpool(h):
        B, C, L = h.shape
        lo = L // 2
        return h[:, :, : lo * 2].reshape(B, C, lo, 2).max(axis=-1)

    h = maxpool(block(h, pt["c1"]))
    h = maxpool(block(h, pt["c2"]))
    h = block(h, pt["c3"])
    flat = h.reshape(h.shape[0], -1)                                # (B, 512)
    z = jnp.maximum(flat @ pt["fc1_w"].T + pt["fc1_b"], 0.0)
    return z @ pt["fc2_w"].T + pt["fc2_b"]


if __name__ == "__main__":
    key = jax.random.PRNGKey(0)
    k_x, k_p, k_x2 = jax.random.split(key, 3)

    pt_params = make_pt_params(k_p)
    kernel_params = to_kernel_params(pt_params)

    # Small shapes consistent with the module: (batch, seq_len=10, input_dim=9).
    B = 4
    x = jax.random.normal(k_x, (B, SEQ_LEN, INPUT_DIM), jnp.float32)
    out = jax.block_until_ready(obfs_forward(x, kernel_params))
    ref = jax.block_until_ready(reference_forward(x, pt_params))
    np.testing.assert_allclose(np.asarray(out), np.asarray(ref), rtol=2e-2, atol=2e-2)

    # Also exercise the batch grid: 2 blocks + batch padding (Bp=32, grid=2).
    B2 = 20
    x2 = jax.random.normal(k_x2, (B2, SEQ_LEN, INPUT_DIM), jnp.float32)
    out2 = jax.block_until_ready(obfs_forward(x2, kernel_params, block_b=16))
    ref2 = jax.block_until_ready(reference_forward(x2, pt_params))
    np.testing.assert_allclose(np.asarray(out2), np.asarray(ref2), rtol=2e-2, atol=2e-2)

    print("KERNEL_OK")
</pallas_src>

<mosaic_0001>
module attributes {stable_mosaic.version = 11 : i64} {
  func.func @obfs_kernel(%arg0: i32, %arg1: memref<10x16x9xf32, #tpu.memory_space<vmem>>, %arg2: memref<9x64xbf16, #tpu.memory_space<vmem>>, %arg3: memref<9x64xbf16, #tpu.memory_space<vmem>>, %arg4: memref<9x64xbf16, #tpu.memory_space<vmem>>, %arg5: memref<1x64xf32, #tpu.memory_space<vmem>>, %arg6: memref<192x128xbf16, #tpu.memory_space<vmem>>, %arg7: memref<1x128xf32, #tpu.memory_space<vmem>>, %arg8: memref<384x256xbf16, #tpu.memory_space<vmem>>, %arg9: memref<1x256xf32, #tpu.memory_space<vmem>>, %arg10: memref<256x128xbf16, #tpu.memory_space<vmem>>, %arg11: memref<256x128xbf16, #tpu.memory_space<vmem>>, %arg12: memref<1x128xf32, #tpu.memory_space<vmem>>, %arg13: memref<128x128xbf16, #tpu.memory_space<vmem>>, %arg14: memref<1x128xf32, #tpu.memory_space<vmem>>, %arg15: memref<16x128xbf16, #tpu.memory_space<vmem>>) attributes {dimension_semantics = [#tpu.dimension_semantics<parallel>], iteration_bounds = array<i64: 1>, scalar_prefetch = 0 : i64, scratch_operands = 0 : i64, tpu.core_type = #tpu.core_type<tc>, window_params = [{transform_indices = @transform_0, window_bounds = array<i64: 10, 16, 9>}, {pipeline_mode = #tpu.pipeline_mode<synchronous>, transform_indices = @transform_1, window_bounds = array<i64: 9, 64>}, {pipeline_mode = #tpu.pipeline_mode<synchronous>, transform_indices = @transform_2, window_bounds = array<i64: 9, 64>}, {pipeline_mode = #tpu.pipeline_mode<synchronous>, transform_indices = @transform_3, window_bounds = array<i64: 9, 64>}, {pipeline_mode = #tpu.pipeline_mode<synchronous>, transform_indices = @transform_4, window_bounds = array<i64: 1, 64>}, {pipeline_mode = #tpu.pipeline_mode<synchronous>, transform_indices = @transform_5, window_bounds = array<i64: 192, 128>}, {pipeline_mode = #tpu.pipeline_mode<synchronous>, transform_indices = @transform_6, window_bounds = array<i64: 1, 128>}, {pipeline_mode = #tpu.pipeline_mode<synchronous>, transform_indices = @transform_7, window_bounds = array<i64: 384, 256>}, {pipeline_mode = #tpu.pipeline_mode<synchronous>, transform_indices = @transform_8, window_bounds = array<i64: 1, 256>}, {pipeline_mode = #tpu.pipeline_mode<synchronous>, transform_indices = @transform_9, window_bounds = array<i64: 256, 128>}, {pipeline_mode = #tpu.pipeline_mode<synchronous>, transform_indices = @transform_10, window_bounds = array<i64: 256, 128>}, {pipeline_mode = #tpu.pipeline_mode<synchronous>, transform_indices = @transform_11, window_bounds = array<i64: 1, 128>}, {pipeline_mode = #tpu.pipeline_mode<synchronous>, transform_indices = @transform_12, window_bounds = array<i64: 128, 128>}, {pipeline_mode = #tpu.pipeline_mode<synchronous>, transform_indices = @transform_13, window_bounds = array<i64: 1, 128>}, {transform_indices = @transform_14, window_bounds = array<i64: 16, 128>}]} {
    %c0 = arith.constant 0 : index
    %c0_0 = arith.constant 0 : index
    %c0_1 = arith.constant 0 : index
    %0 = vector.load %arg1[%c0, %c0_0, %c0_1] : memref<10x16x9xf32, #tpu.memory_space<vmem>>, vector<10x16x9xf32>
    %1 = arith.truncf %0 : vector<10x16x9xf32> to vector<10x16x9xbf16>
    %cst = arith.constant 0.000000e+00 : bf16
    %2 = vector.broadcast %cst : bf16 to vector<1x16x9xbf16>
    %3 = tpu.concatenate %2, %1, %2 in 0 : vector<1x16x9xbf16>, vector<10x16x9xbf16>, vector<1x16x9xbf16> -> vector<12x16x9xbf16>
    %4 = vector.extract_strided_slice %3 {offsets = [0, 0, 0], sizes = [10, 16, 9], strides = [1, 1, 1]} : vector<12x16x9xbf16> to vector<10x16x9xbf16>
    %5 = vector.shape_cast %4 : vector<10x16x9xbf16> to vector<160x9xbf16>
    %6 = vector.shape_cast %1 : vector<10x16x9xbf16> to vector<160x9xbf16>
    %7 = vector.extract_strided_slice %3 {offsets = [2, 0, 0], sizes = [10, 16, 9], strides = [1, 1, 1]} : vector<12x16x9xbf16> to vector<10x16x9xbf16>
    %8 = vector.shape_cast %7 : vector<10x16x9xbf16> to vector<160x9xbf16>
    %c0_2 = arith.constant 0 : index
    %c0_3 = arith.constant 0 : index
    %9 = vector.load %arg2[%c0_2, %c0_3] : memref<9x64xbf16, #tpu.memory_space<vmem>>, vector<9x64xbf16>
    %cst_4 = arith.constant dense<0.000000e+00> : vector<160x64xf32>
    %10 = tpu.matmul %5, %9, %cst_4 {dimension_numbers = #tpu.dot_dimension_numbers<[1], [0], [0], [1], [0, 0, 1, 1], [], []>} : vector<160x9xbf16>, vector<9x64xbf16>, vector<160x64xf32> -> vector<160x64xf32>
    %c0_5 = arith.constant 0 : index
    %c0_6 = arith.constant 0 : index
    %11 = vector.load %arg3[%c0_5, %c0_6] : memref<9x64xbf16, #tpu.memory_space<vmem>>, vector<9x64xbf16>
    %cst_7 = arith.constant dense<0.000000e+00> : vector<160x64xf32>
    %12 = tpu.matmul %6, %11, %cst_7 {dimension_numbers = #tpu.dot_dimension_numbers<[1], [0], [0], [1], [0, 0, 1, 1], [], []>} : vector<160x9xbf16>, vector<9x64xbf16>, vector<160x64xf32> -> vector<160x64xf32>
    %13 = arith.addf %10, %12 : vector<160x64xf32>
    %c0_8 = arith.constant 0 : index
    %c0_9 = arith.constant 0 : index
    %14 = vector.load %arg4[%c0_8, %c0_9] : memref<9x64xbf16, #tpu.memory_space<vmem>>, vector<9x64xbf16>
    %cst_10 = arith.constant dense<0.000000e+00> : vector<160x64xf32>
    %15 = tpu.matmul %8, %14, %cst_10 {dimension_numbers = #tpu.dot_dimension_numbers<[1], [0], [0], [1], [0, 0, 1, 1], [], []>} : vector<160x9xbf16>, vector<9x64xbf16>, vector<160x64xf32> -> vector<160x64xf32>
    %16 = arith.addf %13, %15 : vector<160x64xf32>
    %c0_11 = arith.constant 0 : index
    %c0_12 = arith.constant 0 : index
    %17 = vector.load %arg5[%c0_11, %c0_12] : memref<1x64xf32, #tpu.memory_space<vmem>>, vector<1x64xf32>
    %18 = vector.broadcast %17 : vector<1x64xf32> to vector<160x64xf32>
    %19 = arith.addf %16, %18 : vector<160x64xf32>
    %cst_13 = arith.constant 0.000000e+00 : f32
    %20 = vector.broadcast %cst_13 : f32 to vector<160x64xf32>
    %21 = arith.maximumf %19, %20 : vector<160x64xf32>
    %22 = vector.shape_cast %21 : vector<160x64xf32> to vector<10x16x64xf32>
    %23 = vector.shape_cast %22 : vector<10x16x64xf32> to vector<5x2x16x64xf32>
    %24 = vector.extract_strided_slice %23 {offsets = [0, 0, 0, 0], sizes = [5, 1, 16, 64], strides = [1, 1, 1, 1]} : vector<5x2x16x64xf32> to vector<5x1x16x64xf32>
    %25 = vector.shape_cast %24 : vector<5x1x16x64xf32> to vector<5x16x64xf32>
    %26 = vector.extract_strided_slice %23 {offsets = [0, 1, 0, 0], sizes = [5, 1, 16, 64], strides = [1, 1, 1, 1]} : vector<5x2x16x64xf32> to vector<5x1x16x64xf32>
    %27 = vector.shape_cast %26 : vector<5x1x16x64xf32> to vector<5x16x64xf32>
    %28 = arith.maximumf %25, %27 : vector<5x16x64xf32>
    %29 = arith.truncf %28 : vector<5x16x64xf32> to vector<5x16x64xbf16>
    %cst_14 = arith.constant 0.000000e+00 : bf16
    %30 = vector.broadcast %cst_14 : bf16 to vector<1x16x64xbf16>
    %31 = tpu.concatenate %30, %29, %30 in 0 : vector<1x16x64xbf16>, vector<5x16x64xbf16>, vector<1x16x64xbf16> -> vector<7x16x64xbf16>
    %32 = vector.extract_strided_slice %31 {offsets = [0, 0, 0], sizes = [5, 16, 64], strides = [1, 1, 1]} : vector<7x16x64xbf16> to vector<5x16x64xbf16>
    %33 = vector.shape_cast %32 : vector<5x16x64xbf16> to vector<80x64xbf16>
    %34 = vector.shape_cast %29 : vector<5x16x64xbf16> to vector<80x64xbf16>
    %35 = vector.extract_strided_slice %31 {offsets = [2, 0, 0], sizes = [5, 16, 64], strides = [1, 1, 1]} : vector<7x16x64xbf16> to vector<5x16x64xbf16>
    %36 = vector.shape_cast %35 : vector<5x16x64xbf16> to vector<80x64xbf16>
    %37 = tpu.concatenate %33, %34, %36 in 1 : vector<80x64xbf16>, vector<80x64xbf16>, vector<80x64xbf16> -> vector<80x192xbf16>
    %c0_15 = arith.constant 0 : index
    %c0_16 = arith.constant 0 : index
    %38 = vector.load %arg6[%c0_15, %c0_16] : memref<192x128xbf16, #tpu.memory_space<vmem>>, vector<192x128xbf16>
    %cst_17 = arith.constant dense<0.000000e+00> : vector<80x128xf32>
    %39 = tpu.matmul %37, %38, %cst_17 {dimension_numbers = #tpu.dot_dimension_numbers<[1], [0], [0], [1], [0, 0, 1, 1], [], []>} : vector<80x192xbf16>, vector<192x128xbf16>, vector<80x128xf32> -> vector<80x128xf32>
    %c0_18 = arith.constant 0 : index
    %c0_19 = arith.constant 0 : index
    %40 = vector.load %arg7[%c0_18, %c0_19] : memref<1x128xf32, #tpu.memory_space<vmem>>, vector<1x128xf32>
    %41 = vector.broadcast %40 : vector<1x128xf32> to vector<80x128xf32>
    %42 = arith.addf %39, %41 : vector<80x128xf32>
    %cst_20 = arith.constant 0.000000e+00 : f32
    %43 = vector.broadcast %cst_20 : f32 to vector<80x128xf32>
    %44 = arith.maximumf %42, %43 : vector<80x128xf32>
    %45 = vector.shape_cast %44 : vector<80x128xf32> to vector<5x16x128xf32>
    %46 = vector.extract_strided_slice %45 {offsets = [0, 0, 0], sizes = [4, 16, 128], strides = [1, 1, 1]} : vector<5x16x128xf32> to vector<4x16x128xf32>
    %47 = vector.shape_cast %46 : vector<4x16x128xf32> to vector<2x2x16x128xf32>
    %48 = vector.extract_strided_slice %47 {offsets = [0, 0, 0, 0], sizes = [2, 1, 16, 128], strides = [1, 1, 1, 1]} : vector<2x2x16x128xf32> to vector<2x1x16x128xf32>
    %49 = vector.shape_cast %48 : vector<2x1x16x128xf32> to vector<2x16x128xf32>
    %50 = vector.extract_strided_slice %47 {offsets = [0, 1, 0, 0], sizes = [2, 1, 16, 128], strides = [1, 1, 1, 1]} : vector<2x2x16x128xf32> to vector<2x1x16x128xf32>
    %51 = vector.shape_cast %50 : vector<2x1x16x128xf32> to vector<2x16x128xf32>
    %52 = arith.maximumf %49, %51 : vector<2x16x128xf32>
    %53 = arith.truncf %52 : vector<2x16x128xf32> to vector<2x16x128xbf16>
    %cst_21 = arith.constant 0.000000e+00 : bf16
    %54 = vector.broadcast %cst_21 : bf16 to vector<1x16x128xbf16>
    %55 = tpu.concatenate %54, %53, %54 in 0 : vector<1x16x128xbf16>, vector<2x16x128xbf16>, vector<1x16x128xbf16> -> vector<4x16x128xbf16>
    %56 = vector.extract_strided_slice %55 {offsets = [0, 0, 0], sizes = [2, 16, 128], strides = [1, 1, 1]} : vector<4x16x128xbf16> to vector<2x16x128xbf16>
    %57 = vector.shape_cast %56 : vector<2x16x128xbf16> to vector<32x128xbf16>
    %58 = vector.shape_cast %53 : vector<2x16x128xbf16> to vector<32x128xbf16>
    %59 = vector.extract_strided_slice %55 {offsets = [2, 0, 0], sizes = [2, 16, 128], strides = [1, 1, 1]} : vector<4x16x128xbf16> to vector<2x16x128xbf16>
    %60 = vector.shape_cast %59 : vector<2x16x128xbf16> to vector<32x128xbf16>
    %61 = tpu.concatenate %57, %58, %60 in 1 : vector<32x128xbf16>, vector<32x128xbf16>, vector<32x128xbf16> -> vector<32x384xbf16>
    %c0_22 = arith.constant 0 : index
    %c0_23 = arith.constant 0 : index
    %62 = vector.load %arg8[%c0_22, %c0_23] : memref<384x256xbf16, #tpu.memory_space<vmem>>, vector<384x256xbf16>
    %cst_24 = arith.constant dense<0.000000e+00> : vector<32x256xf32>
    %63 = tpu.matmul %61, %62, %cst_24 {dimension_numbers = #tpu.dot_dimension_numbers<[1], [0], [0], [1], [0, 0, 1, 1], [], []>} : vector<32x384xbf16>, vector<384x256xbf16>, vector<32x256xf32> -> vector<32x256xf32>
    %c0_25 = arith.constant 0 : index
    %c0_26 = arith.constant 0 : index
    %64 = vector.load %arg9[%c0_25, %c0_26] : memref<1x256xf32, #tpu.memory_space<vmem>>, vector<1x256xf32>
    %65 = vector.broadcast %64 : vector<1x256xf32> to vector<32x256xf32>
    %66 = arith.addf %63, %65 : vector<32x256xf32>
    %cst_27 = arith.constant 0.000000e+00 : f32
    %67 = vector.broadcast %cst_27 : f32 to vector<32x256xf32>
    %68 = arith.maximumf %66, %67 : vector<32x256xf32>
    %69 = vector.shape_cast %68 : vector<32x256xf32> to vector<2x16x256xf32>
    %70 = vector.extract_strided_slice %69 {offsets = [0, 0, 0], sizes = [1, 16, 256], strides = [1, 1, 1]} : vector<2x16x256xf32> to vector<1x16x256xf32>
    %71 = vector.shape_cast %70 : vector<1x16x256xf32> to vector<16x256xf32>
    %72 = arith.truncf %71 : vector<16x256xf32> to vector<16x256xbf16>
    %c0_28 = arith.constant 0 : index
    %c0_29 = arith.constant 0 : index
    %73 = vector.load %arg10[%c0_28, %c0_29] : memref<256x128xbf16, #tpu.memory_space<vmem>>, vector<256x128xbf16>
    %cst_30 = arith.constant dense<0.000000e+00> : vector<16x128xf32>
    %74 = tpu.matmul %72, %73, %cst_30 {dimension_numbers = #tpu.dot_dimension_numbers<[1], [0], [0], [1], [0, 0, 1, 1], [], []>} : vector<16x256xbf16>, vector<256x128xbf16>, vector<16x128xf32> -> vector<16x128xf32>
    %75 = vector.extract_strided_slice %69 {offsets = [1, 0, 0], sizes = [1, 16, 256], strides = [1, 1, 1]} : vector<2x16x256xf32> to vector<1x16x256xf32>
    %76 = vector.shape_cast %75 : vector<1x16x256xf32> to vector<16x256xf32>
    %77 = arith.truncf %76 : vector<16x256xf32> to vector<16x256xbf16>
    %c0_31 = arith.constant 0 : index
    %c0_32 = arith.constant 0 : index
    %78 = vector.load %arg11[%c0_31, %c0_32] : memref<256x128xbf16, #tpu.memory_space<vmem>>, vector<256x128xbf16>
    %cst_33 = arith.constant dense<0.000000e+00> : vector<16x128xf32>
    %79 = tpu.matmul %77, %78, %cst_33 {dimension_numbers = #tpu.dot_dimension_numbers<[1], [0], [0], [1], [0, 0, 1, 1], [], []>} : vector<16x256xbf16>, vector<256x128xbf16>, vector<16x128xf32> -> vector<16x128xf32>
    %80 = arith.addf %74, %79 : vector<16x128xf32>
    %c0_34 = arith.constant 0 : index
    %c0_35 = arith.constant 0 : index
    %81 = vector.load %arg12[%c0_34, %c0_35] : memref<1x128xf32, #tpu.memory_space<vmem>>, vector<1x128xf32>
    %82 = vector.broadcast %81 : vector<1x128xf32> to vector<16x128xf32>
    %83 = arith.addf %80, %82 : vector<16x128xf32>
    %cst_36 = arith.constant 0.000000e+00 : f32
    %84 = vector.broadcast %cst_36 : f32 to vector<16x128xf32>
    %85 = arith.maximumf %83, %84 : vector<16x128xf32>
    %86 = arith.truncf %85 : vector<16x128xf32> to vector<16x128xbf16>
    %c0_37 = arith.constant 0 : index
    %c0_38 = arith.constant 0 : index
    %87 = vector.load %arg13[%c0_37, %c0_38] : memref<128x128xbf16, #tpu.memory_space<vmem>>, vector<128x128xbf16>
    %cst_39 = arith.constant dense<0.000000e+00> : vector<16x128xf32>
    %88 = tpu.matmul %86, %87, %cst_39 {dimension_numbers = #tpu.dot_dimension_numbers<[1], [0], [0], [1], [0, 0, 1, 1], [], []>} : vector<16x128xbf16>, vector<128x128xbf16>, vector<16x128xf32> -> vector<16x128xf32>
    %c0_40 = arith.constant 0 : index
    %c0_41 = arith.constant 0 : index
    %89 = vector.load %arg14[%c0_40, %c0_41] : memref<1x128xf32, #tpu.memory_space<vmem>>, vector<1x128xf32>
    %90 = vector.broadcast %89 : vector<1x128xf32> to vector<16x128xf32>
    %91 = arith.addf %88, %90 : vector<16x128xf32>
    %92 = arith.truncf %91 : vector<16x128xf32> to vector<16x128xbf16>
    %c0_42 = arith.constant 0 : index
    %c0_43 = arith.constant 0 : index
    %93 = vector.load %arg15[%c0_42, %c0_43] : memref<16x128xbf16, #tpu.memory_space<vmem>>, vector<16x128xbf16>
    tpu.vector_store %arg15[%c0_42, %c0_43], %92 {strides = array<i32>} : memref<16x128xbf16, #tpu.memory_space<vmem>>, vector<16x128xbf16>,
    return
  }
  func.func @transform_0(%arg0: i32) -> (i32, i32, i32) {
    %c0_i32 = arith.constant 0 : i32
    %c0_i32_0 = arith.constant 0 : i32
    %c0_i32_1 = arith.constant 0 : i32
    return %c0_i32, %arg0, %c0_i32_0 : i32, i32, i32
  }
  func.func @transform_1(%arg0: i32) -> (i32, i32) {
    %c0_i32 = arith.constant 0 : i32
    %c0_i32_0 = arith.constant 0 : i32
    %c0_i32_1 = arith.constant 0 : i32
    return %c0_i32, %c0_i32_0 : i32, i32
  }
  func.func @transform_2(%arg0: i32) -> (i32, i32) {
    %c0_i32 = arith.constant 0 : i32
    %c0_i32_0 = arith.constant 0 : i32
    %c0_i32_1 = arith.constant 0 : i32
    return %c0_i32, %c0_i32_0 : i32, i32
  }
  func.func @transform_3(%arg0: i32) -> (i32, i32) {
    %c0_i32 = arith.constant 0 : i32
    %c0_i32_0 = arith.constant 0 : i32
    %c0_i32_1 = arith.constant 0 : i32
    return %c0_i32, %c0_i32_0 : i32, i32
  }
  func.func @transform_4(%arg0: i32) -> (i32, i32) {
    %c0_i32 = arith.constant 0 : i32
    %c0_i32_0 = arith.constant 0 : i32
    %c0_i32_1 = arith.constant 0 : i32
    return %c0_i32, %c0_i32_0 : i32, i32
  }
  func.func @transform_5(%arg0: i32) -> (i32, i32) {
    %c0_i32 = arith.constant 0 : i32
    %c0_i32_0 = arith.constant 0 : i32
    %c0_i32_1 = arith.constant 0 : i32
    return %c0_i32, %c0_i32_0 : i32, i32
  }
  func.func @transform_6(%arg0: i32) -> (i32, i32) {
    %c0_i32 = arith.constant 0 : i32
    %c0_i32_0 = arith.constant 0 : i32
    %c0_i32_1 = arith.constant 0 : i32
    return %c0_i32, %c0_i32_0 : i32, i32
  }
  func.func @transform_7(%arg0: i32) -> (i32, i32) {
    %c0_i32 = arith.constant 0 : i32
    %c0_i32_0 = arith.constant 0 : i32
    %c0_i32_1 = arith.constant 0 : i32
    return %c0_i32, %c0_i32_0 : i32, i32
  }
  func.func @transform_8(%arg0: i32) -> (i32, i32) {
    %c0_i32 = arith.constant 0 : i32
    %c0_i32_0 = arith.constant 0 : i32
    %c0_i32_1 = arith.constant 0 : i32
    return %c0_i32, %c0_i32_0 : i32, i32
  }
  func.func @transform_9(%arg0: i32) -> (i32, i32) {
    %c0_i32 = arith.constant 0 : i32
    %c0_i32_0 = arith.constant 0 : i32
    %c0_i32_1 = arith.constant 0 : i32
    return %c0_i32, %c0_i32_0 : i32, i32
  }
  func.func @transform_10(%arg0: i32) -> (i32, i32) {
    %c0_i32 = arith.constant 0 : i32
    %c0_i32_0 = arith.constant 0 : i32
    %c0_i32_1 = arith.constant 0 : i32
    return %c0_i32, %c0_i32_0 : i32, i32
  }
  func.func @transform_11(%arg0: i32) -> (i32, i32) {
    %c0_i32 = arith.constant 0 : i32
    %c0_i32_0 = arith.constant 0 : i32
    %c0_i32_1 = arith.constant 0 : i32
    return %c0_i32, %c0_i32_0 : i32, i32
  }
  func.func @transform_12(%arg0: i32) -> (i32, i32) {
    %c0_i32 = arith.constant 0 : i32
    %c0_i32_0 = arith.constant 0 : i32
    %c0_i32_1 = arith.constant 0 : i32
    return %c0_i32, %c0_i32_0 : i32, i32
  }
  func.func @transform_13(%arg0: i32) -> (i32, i32) {
    %c0_i32 = arith.constant 0 : i32
    %c0_i32_0 = arith.constant 0 : i32
    %c0_i32_1 = arith.constant 0 : i32
    return %c0_i32, %c0_i32_0 : i32, i32
  }
  func.func @transform_14(%arg0: i32) -> (i32, i32) {
    %c0_i32 = arith.constant 0 : i32
    %c0_i32_0 = arith.constant 0 : i32
    return %arg0, %c0_i32 : i32, i32
  }
}

</mosaic_0001>

<bundles_post_ra>
// kernel: tpu_custom_call.1
= control target key start
LH: loop header
LB: loop body
LE: loop exit
PB: predicated region body
PF: predicated region fallthrough
CT: control target
= control target key end

     0   :  { %19 = vsyncpa [#allocation3], 0  ;;  %s2935_s0 = inlined_call_operand.vmem [shape: f32[10,16,9], index: 0, kind: input, shape index: {}]   ;;  %s2936_s1 = inlined_call_operand.hbm [shape: bf16[9,64], index: 1, kind: input, shape index: {}]   ;;  %s2937_s2 = inlined_call_operand.hbm [shape: bf16[9,64], index: 2, kind: input, shape index: {}]   ;;  %s2938_s3 = inlined_call_operand.hbm [shape: bf16[9,64], index: 3, kind: input, shape index: {}]   ;;  %s2939_s4 = inlined_call_operand.hbm [shape: f32[1,64], index: 4, kind: input, shape index: {}]   ;;  %s2940_s5 = inlined_call_operand.hbm [shape: bf16[192,128], index: 5, kind: input, shape index: {}]   ;;  %s2941_s6 = inlined_call_operand.hbm [shape: f32[1,128], index: 6, kind: input, shape index: {}]   ;;  %s2942_s7 = inlined_call_operand.hbm [shape: bf16[384,256], index: 7, kind: input, shape index: {}]   ;;  %s2943_s8 = inlined_call_operand.vmem [shape: f32[1,256], index: 8, kind: input, shape index: {}]   ;;  %s2944_s9 = inlined_call_operand.vmem [shape: bf16[256,128], index: 9, kind: input, shape index: {}]   ;;  %s2945_s10 = inlined_call_operand.vmem [shape: bf16[256,128], index: 10, kind: input, shape index: {}]   ;;  %s2946_s11 = inlined_call_operand.hbm [shape: f32[1,128], index: 11, kind: input, shape index: {}]   ;;  %s2947_s12 = inlined_call_operand.vmem [shape: bf16[128,128], index: 12, kind: input, shape index: {}]   ;;  %s2948_s13 = inlined_call_operand.vmem [shape: f32[1,128], index: 13, kind: input, shape index: {}]   ;;  %s2949_s14 = inlined_call_operand.hbm [shape: bf16[16,128], index: 14, kind: output, shape index: {}]  }
   0x1   :  { %20 = vsyncpa [#allocation6], 0 }
   0x2   :  { %21 = vsyncpa [#allocation9], 0 }
   0x3   :  { %22 = vsyncpa [#allocation12], 0 }
   0x4   :  { %23 = vsyncpa [#allocation15], 0 }
   0x5   :  { %24 = vsyncpa [#allocation4], 0  ;;  %s2474_s29 = smov [#allocation5]   ;;  %s2475_s15 = smov [#allocation8]  }
   0x6   :  { %s44_s30 = sshll.u32 %s2474_s29, 4  ;;  %s69_s16 = sshll.u32 %s2475_s15, 4  ;;  %s45_s30 = int_to_ptr.vmem [resolvable:$true] %s44_s30  ;;  %s70_s16 = int_to_ptr.vmem [resolvable:$true] %s69_s16 }
   0x7   :  { %s2290_s17 = scalar_lea.vmem %s45_s30, 128  ;;  %p2295_p1 = scmp.lt.s32.totalorder %s45_s30, %s45_s30 }
   0x8   :  { %p2291_p0 = scmp.ne.s32.totalorder %s45_s30, %s2290_s17  ;;  %p2296_p2 = scmp.lt.s32.totalorder %s2290_s17, %s2290_s17 }
   0xa   :  { %p2297_p3 = por %p2296_p2, %p2295_p1 }
   0xc   :  { %p2298_p4 = pnand %p2297_p3, %p2291_p0 }
   0xe   :  { %2301 = shalt.err (!%p2298_p4)
}
   0xf   :  { %s2476_s18 = smov 64   ;;  %s2477_s19 = smov 4  }
  0x10   :  { %50 = dma.hbm_to_vmem [thread:$0]  %s2937_s2, 128, %s45_s30, [#allocation6], %s2476_s18, %s2476_s18, %s2477_s19  }
  0x11   :  { %s2310_s22 = scalar_lea.vmem %s70_s16, 16  ;;  %s2314_s23 = scalar_lea.vmem %s70_s16, 32 }
  0x12   :  { %p2311_p5 = scmp.ne.s32.totalorder %s70_s16, %s2310_s22  ;;  %p2315_p6 = scmp.lt.s32.totalorder %s70_s16, %s70_s16 }
  0x13   :  { %p2316_p7 = scmp.lt.s32.totalorder %s2314_s23, %s2310_s22 }
  0x15   :  { %p2317_p8 = por %p2316_p7, %p2315_p6 }
  0x17   :  { %p2318_p9 = pnand %p2317_p8, %p2311_p5 }
  0x19   :  { %2321 = shalt.err (!%p2318_p9)
}
  0x1a   :  { %72 = dma.hbm_to_vmem [thread:$0]  %s2939_s4, 16, %s70_s16, [#allocation9]  }
  0x1b   :  { %s2478_s26 = smov [#allocation11]   ;;  %s2479_s28 = smov [#allocation2]  }
  0x1c   :  { %s91_s27 = sshll.u32 %s2478_s26, 4  ;;  %s32_s29 = sshll.u32 %s2479_s28, 4  ;;  %s92_s27 = int_to_ptr.vmem [resolvable:$true] %s91_s27  ;;  %s33_s29 = int_to_ptr.vmem [resolvable:$true] %s32_s29 }
  0x1d   :  { %s2330_s15 = scalar_lea.vmem %s92_s27, 16  ;;  %s2334_s2 = scalar_lea.vmem %s92_s27, 32 }
  0x1e   :  { %p2331_p10 = scmp.ne.s32.totalorder %s92_s27, %s2330_s15  ;;  %p2335_p11 = scmp.lt.s32.totalorder %s92_s27, %s92_s27 }
  0x1f   :  { %p2336_p12 = scmp.lt.s32.totalorder %s2334_s2, %s2330_s15 }
  0x21   :  { %p2337_p13 = por %p2336_p12, %p2335_p11 }
  0x23   :  { %p2338_p0 = pnand %p2337_p13, %p2331_p10 }
  0x25   :  { %2341 = shalt.err (!%p2338_p0)
}
  0x26   :  { %94 = dma.hbm_to_vmem [thread:$0]  %s2941_s6, 16, %s92_s27, [#allocation12]  }
  0x27   :  { %s2350_s20 = scalar_lea.vmem %s33_s29, 128  ;;  %p2355_p2 = scmp.lt.s32.totalorder %s33_s29, %s33_s29 }
  0x28   :  { %p2351_p1 = scmp.ne.s32.totalorder %s33_s29, %s2350_s20  ;;  %p2356_p3 = scmp.lt.s32.totalorder %s2350_s20, %s2350_s20 }
  0x2a   :  { %p2357_p4 = por %p2356_p3, %p2355_p2 }
  0x2c   :  { %p2358_p5 = pnand %p2357_p4, %p2351_p1 }
  0x2e   :  { %2361 = shalt.err (!%p2358_p5)
}
  0x2f   :  { %38 = dma.hbm_to_vmem [thread:$0]  %s2936_s1, 128, %s33_s29, [#allocation3], %s2476_s18, %s2476_s18, %s2477_s19  }
  0x30   :  { %s2480_s21 = smov [#allocation7]   ;;  %s2481_s23 = smov [#allocation10]  }
  0x31   :  { %s56_s22 = sshll.u32 %s2480_s21, 4  ;;  %s78_s24 = sshll.u32 %s2481_s23, 4  ;;  %s57_s22 = int_to_ptr.vmem [resolvable:$true] %s56_s22  ;;  %s79_s24 = int_to_ptr.vmem [resolvable:$true] %s78_s24 }
  0x32   :  { %s2370_s6 = scalar_lea.vmem %s57_s22, 128  ;;  %p2375_p7 = scmp.lt.s32.totalorder %s57_s22, %s57_s22 }
  0x33   :  { %p2371_p6 = scmp.ne.s32.totalorder %s57_s22, %s2370_s6  ;;  %p2376_p8 = scmp.lt.s32.totalorder %s2370_s6, %s2370_s6 }
  0x35   :  { %p2377_p9 = por %p2376_p8, %p2375_p7 }
  0x37   :  { %p2378_p10 = pnand %p2377_p9, %p2371_p6 }
  0x39   :  { %2381 = shalt.err (!%p2378_p10)
}
  0x3a   :  { %62 = dma.hbm_to_vmem [thread:$0]  %s2938_s3, 128, %s57_s22, [#allocation6], %s2476_s18, %s2476_s18, %s2477_s19  }
  0x3b   :  { %s2390_s1 = scalar_lea.vmem %s79_s24, 1536  ;;  %p2395_p12 = scmp.lt.s32.totalorder %s79_s24, %s79_s24 }
  0x3c   :  { %p2391_p11 = scmp.ne.s32.totalorder %s79_s24, %s2390_s1  ;;  %p2396_p13 = scmp.lt.s32.totalorder %s2390_s1, %s2390_s1 }
  0x3e   :  { %p2397_p0 = por %p2396_p13, %p2395_p12 }
  0x40   :  { %p2398_p1 = pnand %p2397_p0, %p2391_p11 }
  0x42   :  { %2401 = shalt.err (!%p2398_p1)
}
  0x43   :  { %84 = dma.hbm_to_vmem [thread:$0]  %s2940_s5, 1536, %s79_s24, [#allocation9], %s2476_s18, %s2476_s18, %s2477_s19  }
  0x44   :  { %s2482_s29 = smov [#allocation13]  }
  0x45   :  { %s100_s15 = sshll.u32 %s2482_s29, 4  ;;  %s101_s15 = int_to_ptr.vmem [resolvable:$true] %s100_s15 }
  0x46   :  { %s2410_s2 = scalar_lea.vmem %s101_s15, 6144  ;;  %p2415_p3 = scmp.lt.s32.totalorder %s101_s15, %s101_s15 }
  0x47   :  { %p2411_p2 = scmp.ne.s32.totalorder %s101_s15, %s2410_s2  ;;  %p2416_p4 = scmp.lt.s32.totalorder %s2410_s2, %s2410_s2 }
  0x49   :  { %p2417_p5 = por %p2416_p4, %p2415_p3 }
  0x4b   :  { %p2418_p6 = pnand %p2417_p5, %p2411_p2 }
  0x4d   :  { %2421 = shalt.err (!%p2418_p6)
}
  0x4e   :  { %s2483_s3 = smov 128   ;;  %s2484_s30 = smov 8  }
  0x4f   :  { %106 = dma.hbm_to_vmem [thread:$0]  %s2942_s7, 6144, %s101_s15, [#allocation12], %s2483_s3, %s2483_s3, %s2484_s30  }
  0x50   :  { %s2485_s4 = smov [#allocation14]  }
  0x51   :  { %s119_s16 = sshll.u32 %s2485_s4, 4  ;;  %s120_s16 = int_to_ptr.vmem [resolvable:$true] %s119_s16 }
  0x52   :  { %s2430_s5 = scalar_lea.vmem %s120_s16, 16  ;;  %s2434_s21 = scalar_lea.vmem %s120_s16, 32 }
  0x53   :  { %p2431_p7 = scmp.ne.s32.totalorder %s120_s16, %s2430_s5  ;;  %p2435_p8 = scmp.lt.s32.totalorder %s120_s16, %s120_s16 }
  0x54   :  { %p2436_p9 = scmp.lt.s32.totalorder %s2434_s21, %s2430_s5 }
  0x56   :  { %p2437_p10 = por %p2436_p9, %p2435_p8 }
  0x58   :  { %p2438_p11 = pnand %p2437_p10, %p2431_p7 }
  0x5a   :  { %2441 = shalt.err (!%p2438_p11)
}
  0x5b   :  { %122 = dma.hbm_to_vmem [thread:$0]  %s2946_s11, 16, %s120_s16, [#allocation15]  }
  0x5c   :  { %2462 = dma.done.wait [#allocation3], 128  }
  0x5d   :  { %2463 = vsyncadd [#allocation3], 4294967168 }
  0x5e   :  { %2464 = dma.done.wait [#allocation6], 256  }
  0x5f   :  { %2465 = vsyncadd [#allocation6], 4294967040 }
  0x60   :  { %2466 = dma.done.wait [#allocation9], 1552  }
  0x61   :  { %2467 = vsyncadd [#allocation9], 4294965744 }
  0x62   :  { %2468 = dma.done.wait [#allocation12], 6160  }
  0x63   :  { %2469 = vsyncadd [#allocation12], 4294961136 }
  0x64   :  { %2470 = dma.done.wait [#allocation15], 16  }
  0x65   :  { %2471 = vsyncadd [#allocation15], 4294967280  ;;  %vm222_vm0 = vcmask 1043456   ;;  %v2486_v0 = vmov 0   ;;  %vm223_vm1 = vcmask 1044480   ;;  %v2487_v1 = vmov 65535  }
  0x66   :  { %2076 = vmatprep.mubr.bf16.mxu1 %v2486_v0  ;;  %v224_v2 = vsel %vm222_vm0, 4294967295, %v2487_v1  ;;  %v2155_v4 = vld [vmem:[#allocation5] sm:$0x1f]   ;;  %v2156_v5 = vld [vmem:[#allocation2] sm:$0x1f]   ;;  %v154_v9 = vld [vmem:[%s2935_s0 + $0x10] sm:$0xff] }
  0x67   :  { %v225_v3 = vsel %vm223_vm1, %v224_v2, 0  ;;  %v152_v7 = vld [vmem:[%s2935_s0] sm:$0xff]  ;;  %v153_v8 = vld [vmem:[%s2935_s0 + $0x8] sm:$0xff]  ;;  %vm191_vm2 = vcmask 72704   ;;  %v155_v12 = vld [vmem:[%s2935_s0 + $0x18] sm:$0xff]  ;;  %vm686_vm3 = vcmask 523264  }
  0x68   :  { %v227_v6 = vand.u32 %v2155_v4, %v225_v3  ;;  %v351_v10 = vand.u32 %v2156_v5, %v225_v3  ;;  %v172_v11 = vpack.c.bf16 %v153_v8, %v152_v7  ;;  %v173_v13 = vpack.c.bf16 %v155_v12, %v154_v9  ;;  %v2157_v14 = vld [vmem:[#allocation7] sm:$0x1f]   ;;  %v156_v15 = vld [vmem:[%s2935_s0 + $0x20] sm:$0xff]  ;;  %v157_v16 = vld [vmem:[%s2935_s0 + $0x28] sm:$0xff]  ;;  %s2490_s1 = smov [#allocation16]  }
  0x69   :  { %v474_v17 = vand.u32 %v2157_v14, %v225_v3  ;;  %v174_v18 = vpack.c.bf16 %v157_v16, %v156_v15  ;;  %v158_v19 = vld [vmem:[%s2935_s0 + $0x30] sm:$0xff]  ;;  %v159_v20 = vld [vmem:[%s2935_s0 + $0x38] sm:$0xff]  ;;  %v160_v21 = vld [vmem:[%s2935_s0 + $0x40] sm:$0xff]  ;;  %vm2489_vm5 = vmmov 0   ;;  %s1800_s27 = sshll.u32 %s2490_s1, 4  ;;  %s1801_s27 = int_to_ptr.vmem [resolvable:$true] %s1800_s27 }
  0x6a   :  { %2052 = vmatprep.subr.bf16.mxu0 %v227_v6  ;;  %2074 = vmatprep.subr.bf16.mxu1 %v351_v10  ;;  %v161_v22 = vld [vmem:[%s2935_s0 + $0x48] sm:$0xff]  ;;  %v175_v23 = vpack.c.bf16 %v159_v20, %v158_v19  ;;  %v162_v25 = vld [vmem:[%s2935_s0 + $0x50] sm:$0xff]  ;;  %v163_v26 = vld [vmem:[%s2935_s0 + $0x58] sm:$0xff]  ;;  %s2442_s28 = scalar_lea.vmem %s1801_s27, 128  ;;  %p2447_p13 = scmp.lt.s32.totalorder %s1801_s27, %s1801_s27 }
  0x6b   :  { %2053 = vmatpush3.bf16.msra.mxu0 %v227_v6  ;;  %2075 = vmatpush3.bf16.msra.mxu1 %v351_v10  ;;  %v176_v24 = vpack.c.bf16 %v161_v22, %v160_v21  ;;  %v164_v27 = vld [vmem:[%s2935_s0 + $0x60] sm:$0xff]  ;;  %v165_v28 = vld [vmem:[%s2935_s0 + $0x68] sm:$0xff]  ;;  %v177_v29 = vpack.c.bf16 %v163_v26, %v162_v25  ;;  %v166_v31 = vld [vmem:[%s2935_s0 + $0x70] sm:$0xff]  ;;  %p2443_p12 = scmp.ne.s32.totalorder %s1801_s27, %s2442_s28  ;;  %p2448_p0 = scmp.lt.s32.totalorder %s2442_s28, %s2442_s28 }
  0x6c   :  { %2054 = vmatprep.mubr.msk.bf16.mxu0 %vm191_vm2, %v172_v11  ;;  %820 = vmatprep.subr.bf16.mxu1 %v2486_v0  ;;  %v178_v30 = vpack.c.bf16 %v165_v28, %v164_v27  ;;  %v167_v32 = vld [vmem:[%s2935_s0 + $0x78] sm:$0xff]  ;;  %v168_v33 = vld [vmem:[%s2935_s0 + $0x80] sm:$0xff]  ;;  %v169_v34 = vld [vmem:[%s2935_s0 + $0x88] sm:$0xff] }
  0x6d   :  { %2096 = vmatprep.subr.bf16.mxu0 %v474_v17  ;;  %v179_v35 = vpack.c.bf16 %v167_v32, %v166_v31  ;;  %v180_v36 = vpack.c.bf16 %v169_v34, %v168_v33  ;;  %v170_v37 = vld [vmem:[%s2935_s0 + $0x90] sm:$0xff]  ;;  %v171_v38 = vld [vmem:[%s2935_s0 + $0x98] sm:$0xff]  ;;  %v2160_v42 = vld [vmem:[#allocation10 + $0x28] sm:$0xff]   ;;  %p2449_p1 = por %p2448_p0, %p2447_p13 }
  0x6e   :  { %2055 = vmatmul.mubr.msk.bf16.vlgmr.msra.gmra.mxu0 %vm191_vm2, %v173_v13  ;;  %2077 = vmatmul.mubr.msk.bf16.vlgmr.msra.gmra.mxu1 %vm191_vm2, %v172_v11  ;;  %v181_v39 = vpack.c.bf16 %v171_v38, %v170_v37  ;;  %v2158_v40 = vld [vmem:[#allocation10 + $0x38] sm:$0xff]   ;;  %v2159_v41 = vld [vmem:[#allocation10 + $0x30] sm:$0xff]   ;;  %v2161_v43 = vld [vmem:[#allocation10 + $0x20] sm:$0xff]  }
  0x6f   :  { %2097 = vmatpush3.bf16.msra.mxu0 %v474_v17  ;;  %2058 = vmatprep.mubr.msk.bf16.mxu0 %vm191_vm2, %v174_v18  ;;  %v2162_v44 = vld [vmem:[#allocation10 + $0x18] sm:$0xff]   ;;  %v2163_v45 = vld [vmem:[#allocation10 + $0x10] sm:$0xff]   ;;  %v2164_v46 = vld [vmem:[#allocation10 + $0x8] sm:$0xff]   ;;  %p2450_p2 = pnand %p2449_p1, %p2443_p12 }
  0x70   :  { %2080 = vmatprep.mubr.msk.bf16.mxu1 %vm191_vm2, %v173_v13  ;;  %821 = vmatpush1.bf16.msra.mxu1 %v2158_v40  ;;  %v2165_v47 = vld [vmem:[#allocation10] sm:$0xff]   ;;  %v2166_v48 = vld [vmem:[#allocation10 + $0x58] sm:$0xff]   ;;  %v2167_v49 = vld [vmem:[#allocation10 + $0x50] sm:$0xff]  }
  0x71   :  { %822 = vmatprep.subr.bf16.mxu1 %v2486_v0  ;;  %v2168_v50 = vld [vmem:[#allocation10 + $0x48] sm:$0xff]   ;;  %v2169_v55 = vld [vmem:[#allocation10 + $0x40] sm:$0xff]   ;;  %v2724_v28 = vld [vmem:[#allocation8] ss:$0 sm:$0xff] }
  0x72   :  { %vm1862_vm4 = vmneg %vm686_vm3 }
  0x74   :  { %823 = vmatpush1.bf16.msra.mxu1 %v2159_v41 }
  0x75   :  { %824 = vmatprep.subr.bf16.mxu1 %v2486_v0 }
  0x76   :  { %2059 = vmatmul.mubr.msk.bf16.gmra.mxu0 %vm191_vm2, %v175_v23  ;;  %2081 = vmatmul.mubr.msk.bf16.gmra.mxu1 %vm191_vm2, %v174_v18 }
  0x77   :  { %2062 = vmatprep.mubr.msk.bf16.mxu0 %vm191_vm2, %v176_v24  ;;  %2084 = vmatprep.mubr.msk.bf16.mxu1 %vm191_vm2, %v175_v23 }
  0x78   :  { %825 = vmatpush1.bf16.msra.mxu1 %v2160_v42 }
  0x79   :  { %826 = vmatprep.subr.bf16.mxu1 %v2486_v0 }
  0x7c   :  { %827 = vmatpush1.bf16.msra.mxu1 %v2161_v43 }
  0x7d   :  { %828 = vmatprep.subr.bf16.mxu1 %v2486_v0 }
  0x7e   :  { %2063 = vmatmul.mubr.msk.bf16.gmra.mxu0 %vm191_vm2, %v177_v29  ;;  %2085 = vmatmul.mubr.msk.bf16.gmra.mxu1 %vm191_vm2, %v176_v24 }
  0x7f   :  { %2066 = vmatprep.mubr.msk.bf16.mxu0 %vm191_vm2, %v178_v30  ;;  %2088 = vmatprep.mubr.msk.bf16.mxu1 %vm191_vm2, %v177_v29 }
  0x80   :  { %829 = vmatpush1.bf16.msra.mxu1 %v2162_v44 }
  0x81   :  { %830 = vmatprep.subr.bf16.mxu1 %v2486_v0 }
  0x84   :  { %831 = vmatpush1.bf16.msra.mxu1 %v2163_v45 }
  0x85   :  { %832 = vmatprep.subr.bf16.mxu1 %v2486_v0 }
  0x86   :  { %2067 = vmatmul.mubr.msk.bf16.gmra.mxu0 %vm191_vm2, %v179_v35  ;;  %2089 = vmatmul.mubr.msk.bf16.gmra.mxu1 %vm191_vm2, %v178_v30 }
  0x87   :  { %2070 = vmatprep.mubr.msk.bf16.mxu0 %vm191_vm2, %v180_v36  ;;  %2092 = vmatprep.mubr.msk.bf16.mxu1 %vm191_vm2, %v179_v35 }
  0x88   :  { %833 = vmatpush1.bf16.msra.mxu1 %v2164_v46 }
  0x89   :  { %834 = vmatprep.subr.bf16.mxu1 %v2486_v0 }
  0x8c   :  { %835 = vmatpush1.bf16.msra.mxu1 %v2165_v47 }
  0x8d   :  { %844 = vmatprep.subr.bf16.mxu1 %v2486_v0 }
  0x8e   :  { %2071 = vmatmul.mubr.msk.bf16.gmra.mxu0 %vm191_vm2, %v181_v39  ;;  %2093 = vmatmul.mubr.msk.bf16.gmra.mxu1 %vm191_vm2, %v180_v36 }
  0x8f   :  { %2098 = vmatprep.mubr.msk.bf16.mxu0 %vm191_vm2, %v173_v13 }
  0x90   :  { %845 = vmatpush2.bf16.msra.mxu1 %v2166_v48 }
  0x91   :  { %846 = vmatprep.subr.bf16.mxu1 %v2486_v0 }
  0x94   :  { %847 = vmatpush2.bf16.msra.mxu1 %v2167_v49 }
  0x95   :  { %848 = vmatprep.subr.bf16.mxu1 %v2486_v0 }
  0x96   :  { %2099 = vmatmul.mubr.msk.bf16.vlgmr.msra.gmra.mxu0 %vm191_vm2, %v174_v18 }
  0x97   :  { %2102 = vmatprep.mubr.msk.bf16.mxu0 %vm191_vm2, %v175_v23 }
  0x98   :  { %849 = vmatpush2.bf16.msra.mxu1 %v2168_v50 }
  0x99   :  { %850 = vmatprep.subr.bf16.mxu1 %v2486_v0 }
  0x9c   :  { %851 = vmatpush2.bf16.msra.mxu1 %v2169_v55 }
  0x9e   :  { %2103 = vmatmul.mubr.msk.bf16.gmra.mxu0 %vm191_vm2, %v176_v24 }
  0x9f   :  { %2106 = vmatprep.mubr.msk.bf16.mxu0 %vm191_vm2, %v177_v29 }
  0xa6   :  { %2107 = vmatmul.mubr.msk.bf16.gmra.mxu0 %vm191_vm2, %v178_v30 }
  0xa7   :  { %2110 = vmatprep.mubr.msk.bf16.mxu0 %vm191_vm2, %v179_v35 }
  0xae   :  { %2111 = vmatmul.mubr.msk.bf16.gmra.mxu0 %vm191_vm2, %v180_v36 }
  0xaf   :  { %2114 = vmatprep.mubr.msk.bf16.mxu0 %vm191_vm2, %v181_v39 }
  0xb6   :  { %2115 = vmatmul.mubr.bf16.gmra.mxu0 %v2486_v0 }
 0x12e   :  { %v2056_v51 = vpop.f32.mrf.mxu0  ;;  %v2078_v52 = vpop.f32.mrf.mxu1 }
 0x12f   :  { %v396_v21 = vadd.f32 %v2078_v52, %v2056_v51 }
 0x130   :  { %v263_v53 = vpop.f32.mrf.mxu0  ;;  %v387_v54 = vpop.f32.mrf.mxu1 }
 0x131   :  { %v388_v22 = vadd.f32 %v387_v54, %v263_v53 }
 0x132   :  { %v2057_v56 = vpop.f32.mrf.mxu0  ;;  %v2079_v57 = vpop.f32.mrf.mxu1 }
 0x133   :  { %v399_v25 = vadd.f32 %v2079_v57, %v2057_v56 }
 0x134   :  { %v266_v58 = vpop.f32.mrf.mxu0  ;;  %v390_v60 = vpop.f32.mrf.mxu1 }
 0x135   :  { %v391_v30 = vadd.f32 %v390_v60, %v266_v58 }
 0x136   :  { %v2060_v59 = vpop.f32.mrf.mxu0  ;;  %v2082_v63 = vpop.f32.mrf.mxu1 }
 0x137   :  { %v412_v38 = vadd.f32 %v2082_v63, %v2060_v59 }
 0x138   :  { %v279_v61 = vpop.f32.mrf.mxu0  ;;  %v403_v3 = vpop.f32.mrf.mxu1 }
 0x139   :  { %v404_v40 = vadd.f32 %v403_v3, %v279_v61 }
 0x13a   :  { %v2061_v62 = vpop.f32.mrf.mxu0  ;;  %v2083_v6 = vpop.f32.mrf.mxu1 }
 0x13b   :  { %v415_v44 = vadd.f32 %v2083_v6, %v2061_v62 }
 0x13c   :  { %v282_v1 = vpop.f32.mrf.mxu0  ;;  %v406_v9 = vpop.f32.mrf.mxu1 }
 0x13d   :  { %v407_v51 = vadd.f32 %v406_v9, %v282_v1 }
 0x13e   :  { %v2064_v2 = vpop.f32.mrf.mxu0  ;;  %v2086_v12 = vpop.f32.mrf.mxu1 }
 0x13f   :  { %v428_v3 = vadd.f32 %v2086_v12, %v2064_v2 }
 0x140   :  { %v295_v4 = vpop.f32.mrf.mxu0  ;;  %v419_v15 = vpop.f32.mrf.mxu1 }
 0x141   :  { %v420_v6 = vadd.f32 %v419_v15, %v295_v4 }
 0x142   :  { %v2704_v5 = vpop.f32.mrf.mxu0  ;;  %v2087_v18 = vpop.f32.mrf.mxu1 }
 0x144   :  { %v2706_v7 = vpop.f32.mrf.mxu0  ;;  %v422_v23 = vpop.f32.mrf.mxu1 }
 0x146   :  { %v2708_v8 = vpop.f32.mrf.mxu0  ;;  %v2090_v31 = vpop.f32.mrf.mxu1 }
 0x148   :  { %v2710_v10 = vpop.f32.mrf.mxu0  ;;  %v435_v41 = vpop.f32.mrf.mxu1 }
 0x14a   :  { %v2712_v11 = vpop.f32.mrf.mxu0  ;;  %v2091_v53 = vpop.f32.mrf.mxu1 }
 0x14c   :  { %v2714_v13 = vpop.f32.mrf.mxu0 }
 0x14e   :  { %v2716_v14 = vpop.f32.mrf.mxu0 }
 0x150   :  { %v2718_v16 = vpop.f32.mrf.mxu0 }
 0x152   :  { %v2720_v17 = vpop.f32.mrf.mxu0 }
 0x154   :  { %v2722_v19 = vpop.f32.mrf.mxu0 }
 0x156   :  { %v2100_v20 = vpop.f32.mrf.mxu0 }
 0x157   :  { %v591_v26 = vadd.f32 %v2100_v20, %v396_v21  ;;  %v438_v20 = vpop.f32.mrf.mxu1  ;;  %v431_v21 = vadd.f32 %v2087_v18, %v2704_v5 }
 0x158   :  { %v510_v24 = vpop.f32.mrf.mxu0 }
 0x159   :  { %v589_v27 = vadd.f32 %v510_v24, %v388_v22  ;;  %v618_v35 = vadd.f32 %v2724_v28, %v591_v26  ;;  %v2094_v2 = vpop.f32.mrf.mxu1 }
 0x15a   :  { %v2101_v29 = vpop.f32.mrf.mxu0 }
 0x15b   :  { %v616_v32 = vadd.f32 %v2724_v28, %v589_v27  ;;  %v592_v33 = vadd.f32 %v2101_v29, %v399_v25  ;;  %v638_v47 = vmax.f32 %v618_v35, 0.0 }
 0x15c   :  { %v513_v34 = vpop.f32.mrf.mxu0 }
 0x15d   :  { %v619_v36 = vadd.f32 %v2724_v28, %v592_v33  ;;  %v590_v37 = vadd.f32 %v513_v34, %v391_v30  ;;  %v636_v42 = vmax.f32 %v616_v32, 0.0  ;;  %v423_v30 = vadd.f32 %v422_v23, %v2706_v7  ;;  %v451_v23 = vpop.f32.mrf.mxu1 }
 0x15e   :  { %v2104_v39 = vpop.f32.mrf.mxu0  ;;  %v436_v7 = vadd.f32 %v435_v41, %v2710_v10  ;;  %v439_v10 = vadd.f32 %v438_v20, %v2714_v13  ;;  %v452_v13 = vadd.f32 %v451_v23, %v2718_v16  ;;  %v2181_v23 = vld [vmem:[#allocation13 + $0x44] ss:$8 sps:$4 sm:$0xff]  }
 0x15f   :  { %v617_v43 = vadd.f32 %v2724_v28, %v590_v37  ;;  %v595_v45 = vadd.f32 %v2104_v39, %v412_v38  ;;  %v639_v48 = vmax.f32 %v619_v36, 0.0  ;;  %v656_v56 = vmax.f32 %v636_v42, %v638_v47  ;;  %v2095_v47 = vpop.f32.mrf.mxu1 }
 0x160   :  { %v526_v46 = vpop.f32.mrf.mxu0  ;;  %v444_v37 = vadd.f32 %v2090_v31, %v2708_v8  ;;  %v447_v42 = vadd.f32 %v2091_v53, %v2712_v11 }
 0x161   :  { %v637_v49 = vmax.f32 %v617_v43, 0.0  ;;  %v593_v50 = vadd.f32 %v526_v46, %v404_v40  ;;  %v622_v58 = vadd.f32 %v2724_v28, %v595_v45 }
 0x162   :  { %v2105_v52 = vpop.f32.mrf.mxu0 }
 0x163   :  { %v620_v54 = vadd.f32 %v2724_v28, %v593_v50  ;;  %v596_v55 = vadd.f32 %v2105_v52, %v415_v44  ;;  %v657_v57 = vmax.f32 %v637_v49, %v639_v48  ;;  %v642_v22 = vmax.f32 %v622_v58, 0.0  ;;  %v454_v58 = vpop.f32.mrf.mxu1 }
 0x164   :  { %v529_v59 = vpop.f32.mrf.mxu0 }
 0x165   :  { %v623_v60 = vadd.f32 %v2724_v28, %v596_v55  ;;  %v594_v61 = vadd.f32 %v529_v59, %v407_v51  ;;  %v2733_v62 = vpack.c.bf16 %v657_v57, %v656_v56  ;;  %v640_v1 = vmax.f32 %v620_v54, 0.0 }
 0x166   :  { %v2108_v63 = vpop.f32.mrf.mxu0  ;;  %v460_v57 = vadd.f32 %v2094_v2, %v2716_v14 }
 0x167   :  { %v621_v9 = vadd.f32 %v2724_v28, %v594_v61  ;;  %676 = vrot.lane.b32.xlu0 %v2733_v62, %s2476_s18  ;;  %v643_v25 = vmax.f32 %v623_v60, 0.0  ;;  %v599_v27 = vadd.f32 %v2108_v63, %v428_v3  ;;  %v658_v4 = vmax.f32 %v640_v1, %v642_v22 }
 0x168   :  { %v542_v24 = vpop.f32.mrf.mxu0  ;;  %v463_v61 = vadd.f32 %v2095_v47, %v2720_v17  ;;  %v2194_v47 = vld [vmem:[#allocation13 + $0x170] ss:$8 sps:$4 sm:$0xff]  }
 0x169   :  { %v641_v26 = vmax.f32 %v621_v9, 0.0  ;;  %v597_v29 = vadd.f32 %v542_v24, %v420_v6  ;;  %v626_v35 = vadd.f32 %v2724_v28, %v599_v27  ;;  %v2172_v27 = vld [vmem:[#allocation13 + $0x74] ss:$8 sps:$4 sm:$0xff]  }
 0x16a   :  { %v2109_v32 = vpop.f32.mrf.mxu0  ;;  %1205 = vmatprep.subr.bf16.mxu0 %v2172_v27  ;;  %v2235_v27 = vld [vmem:[#allocation13 + $0x84] ss:$8 sps:$4 sm:$0xff]  }
 0x16b   :  { %v659_v12 = vmax.f32 %v641_v26, %v643_v25  ;;  %v624_v15 = vadd.f32 %v2724_v28, %v597_v29  ;;  %v600_v33 = vadd.f32 %v2109_v32, %v431_v21  ;;  %v646_v45 = vmax.f32 %v626_v35, 0.0  ;;  %v2170_v26 = vld [vmem:[#allocation13 + $0x70] ss:$8 sps:$4 sm:$0xff]  }
 0x16c   :  { %v545_v34 = vpop.f32.mrf.mxu0  ;;  %v455_v21 = vadd.f32 %v454_v58, %v2722_v19  ;;  %1206 = vmatpush1.bf16.msra.mxu0 %v2170_v26  ;;  %v2173_v19 = vld [vmem:[#allocation13 + $0x60] ss:$8 sps:$4 sm:$0xff]   ;;  %v2208_v58 = vld [vmem:[#allocation13 + $0xd4] ss:$8 sps:$4 sm:$0xff]   ;;  %v2232_v26 = vld [vmem:[#allocation13 + $0x124] ss:$8 sps:$4 sm:$0xff]  }
 0x16d   :  { %v627_v5 = vadd.f32 %v2724_v28, %v600_v33  ;;  %v598_v18 = vadd.f32 %v545_v34, %v423_v30  ;;  %v2743_v36 = vpack.c.bf16 %v659_v12, %v658_v4  ;;  %v644_v39 = vmax.f32 %v624_v15, 0.0  ;;  %v2175_v30 = vld [vmem:[#allocation13 + $0x64] ss:$8 sps:$4 sm:$0xff]   ;;  %v2178_v33 = vld [vmem:[#allocation13 + $0x54] ss:$8 sps:$4 sm:$0xff]  }
 0x16e   :  { %v2112_v38 = vpop.f32.mrf.mxu0  ;;  %1207 = vmatprep.subr.bf16.mxu0 %v2175_v30  ;;  %v2238_v30 = vld [vmem:[#allocation13 + $0x114] ss:$8 sps:$4 sm:$0xff]  }
 0x16f   :  { %v625_v40 = vadd.f32 %v2724_v28, %v598_v18  ;;  %678 = vrot.lane.b32.xlu0 %v2743_v36, %s2476_s18  ;;  %1861 = vmatprep.mubr.msk.bf16.mxu1 %vm686_vm3, %v2743_v36  ;;  %v603_v43 = vadd.f32 %v2112_v38, %v444_v37  ;;  %v647_v46 = vmax.f32 %v627_v5, 0.0  ;;  %v660_v48 = vmax.f32 %v644_v39, %v646_v45  ;;  %v2176_v18 = vld [vmem:[#allocation13 + $0x50] ss:$8 sps:$4 sm:$0xff]   ;;  %v2196_v37 = vld [vmem:[#allocation13 + $0x174] ss:$8 sps:$4 sm:$0xff]  }
 0x170   :  { %v558_v44 = vpop.f32.mrf.mxu0  ;;  %1208 = vmatpush1.bf16.msra.mxu0 %v2173_v19  ;;  %1258 = vmatprep.subr.bf16.mxu1 %v2196_v37  ;;  %v2190_v45 = vld [vmem:[#allocation13 + $0x14] ss:$8 sps:$4 sm:$0xff]  }
 0x171   :  { %v645_v8 = vmax.f32 %v625_v40, 0.0  ;;  %v601_v31 = vadd.f32 %v558_v44, %v436_v7  ;;  %v630_v52 = vadd.f32 %v2724_v28, %v603_v43  ;;  %1209 = vmatprep.subr.bf16.mxu0 %v2178_v33  ;;  %v2179_v40 = vld [vmem:[#allocation13 + $0x40] ss:$8 sps:$4 sm:$0xff]   ;;  %v2187_v43 = vld [vmem:[#allocation13 + $0x24] ss:$8 sps:$4 sm:$0xff]  }
 0x172   :  { %v2113_v41 = vpop.f32.mrf.mxu0  ;;  %v2185_v44 = vld [vmem:[#allocation13 + $0x20] ss:$8 sps:$4 sm:$0xff]  }
 0x173   :  { %v661_v49 = vmax.f32 %v645_v8, %v647_v46  ;;  %v628_v50 = vadd.f32 %v2724_v28, %v601_v31  ;;  %v604_v51 = vadd.f32 %v2113_v41, %v447_v42  ;;  %v650_v63 = vmax.f32 %v630_v52, 0.0  ;;  %v2182_v42 = vld [vmem:[#allocation13 + $0x30] ss:$8 sps:$4 sm:$0xff]   ;;  %v2193_v8 = vld [vmem:[#allocation13 + $0x4] ss:$8 sps:$4 sm:$0xff]   ;;  %v2246_v19 = vld [vmem:[%s2945_s10 + $0x78] sm:$0xff]  }
 0x174   :  { %v561_v54 = vpop.f32.mrf.mxu0  ;;  %1210 = vmatpush1.bf16.msra.mxu0 %v2176_v18  ;;  %v2188_v46 = vld [vmem:[#allocation13 + $0x10] ss:$8 sps:$4 sm:$0xff]   ;;  %v2191_v31 = vld [vmem:[#allocation13] ss:$8 sps:$4 sm:$0xff]  }
 0x175   :  { %v631_v11 = vadd.f32 %v2724_v28, %v604_v51  ;;  %v602_v53 = vadd.f32 %v561_v54, %v439_v10  ;;  %v2757_v55 = vpack.c.bf16 %v661_v49, %v660_v48  ;;  %v648_v59 = vmax.f32 %v628_v50, 0.0  ;;  %1211 = vmatprep.subr.bf16.mxu0 %v2181_v23  ;;  %v2199_v10 = vld [vmem:[#allocation13 + $0xf4] ss:$8 sps:$4 sm:$0xff]   ;;  %v2197_v41 = vld [vmem:[#allocation13 + $0xf0] ss:$8 sps:$4 sm:$0xff]  }
 0x176   :  { %v2116_v56 = vpop.f32.mrf.mxu0 }
 0x177   :  { %v629_v60 = vadd.f32 %v2724_v28, %v602_v53  ;;  %680 = vrot.lane.b32.xlu1 %v2757_v55, %s2476_s18  ;;  %v651_v6 = vmax.f32 %v631_v11, 0.0  ;;  %v607_v1 = vadd.f32 %v2116_v56, %v460_v57  ;;  %v662_v22 = vmax.f32 %v648_v59, %v650_v63  ;;  %v2202_v56 = vld [vmem:[#allocation13 + $0xe4] ss:$8 sps:$4 sm:$0xff]   ;;  %v2200_v57 = vld [vmem:[#allocation13 + $0xe0] ss:$8 sps:$4 sm:$0xff]  }
 0x178   :  { %v574_v3 = vpop.f32.mrf.mxu0  ;;  %1212 = vmatpush1.bf16.msra.mxu0 %v2179_v40  ;;  %v2209_v59 = vld [vmem:[#allocation13 + $0x150] ss:$8 sps:$4 sm:$0xff]   ;;  %v2212_v63 = vld [vmem:[#allocation13 + $0xc0] ss:$8 sps:$4 sm:$0xff]  }
 0x179   :  { %v649_v20 = vmax.f32 %v629_v60, 0.0  ;;  %v605_v9 = vadd.f32 %v574_v3, %v452_v13  ;;  %v634_v17 = vadd.f32 %v2724_v28, %v607_v1  ;;  %v2205_v13 = vld [vmem:[#allocation13 + $0x164] ss:$8 sps:$4 sm:$0xff]   ;;  %v2211_v60 = vld [vmem:[#allocation13 + $0x154] ss:$8 sps:$4 sm:$0xff]  }
 0x17a   :  { %v2117_v14 = vpop.f32.mrf.mxu0  ;;  %v2220_v3 = vld [vmem:[#allocation13 + $0xb4] ss:$8 sps:$4 sm:$0xff]   ;;  %v2226_v1 = vld [vmem:[#allocation13 + $0xa4] ss:$8 sps:$4 sm:$0xff]  }
 0x17b   :  { %v663_v16 = vmax.f32 %v649_v20, %v651_v6  ;;  %v632_v24 = vadd.f32 %v2724_v28, %v605_v9  ;;  %v608_v25 = vadd.f32 %v2117_v14, %v463_v61  ;;  %v654_v34 = vmax.f32 %v634_v17, 0.0  ;;  %v2214_v61 = vld [vmem:[#allocation13 + $0xc4] ss:$8 sps:$4 sm:$0xff]   ;;  %v2218_v6 = vld [vmem:[#allocation13 + $0xb0] ss:$8 sps:$4 sm:$0xff]  }
 0x17c   :  { %v577_v29 = vpop.f32.mrf.mxu0  ;;  %v2217_v20 = vld [vmem:[#allocation13 + $0x144] ss:$8 sps:$4 sm:$0xff]   ;;  %v2215_v9 = vld [vmem:[#allocation13 + $0x140] ss:$8 sps:$4 sm:$0xff]   ;;  %v2221_v14 = vld [vmem:[#allocation13 + $0x130] ss:$8 sps:$4 sm:$0xff]  }
 0x17d   :  { %v635_v32 = vadd.f32 %v2724_v28, %v608_v25  ;;  %v606_v2 = vadd.f32 %v577_v29, %v455_v21  ;;  %v2769_v4 = vpack.c.bf16 %v663_v16, %v662_v22  ;;  %v652_v12 = vmax.f32 %v632_v24, 0.0  ;;  %v2224_v21 = vld [vmem:[#allocation13 + $0xa0] ss:$8 sps:$4 sm:$0xff]   ;;  %v2223_v22 = vld [vmem:[#allocation13 + $0x134] ss:$8 sps:$4 sm:$0xff]  }
 0x17e   :  { %v2229_v16 = vld [vmem:[#allocation13 + $0x94] ss:$8 sps:$4 sm:$0xff]   ;;  %v2227_v24 = vld [vmem:[#allocation13 + $0x90] ss:$8 sps:$4 sm:$0xff]   ;;  %v2230_v25 = vld [vmem:[#allocation13 + $0x120] ss:$8 sps:$4 sm:$0xff]  }
 0x17f   :  { %v633_v15 = vadd.f32 %v2724_v28, %v606_v2  ;;  %682 = vrot.lane.b32.xlu1 %v2769_v4, %s2476_s18  ;;  %v655_v35 = vmax.f32 %v635_v32, 0.0  ;;  %v664_v38 = vmax.f32 %v652_v12, %v654_v34  ;;  %v2184_v28 = vld [vmem:[#allocation13 + $0x34] ss:$8 sps:$4 sm:$0xff]   ;;  %v2233_v29 = vld [vmem:[#allocation13 + $0x80] ss:$8 sps:$4 sm:$0xff]  }
 0x180   :  { %1213 = vmatprep.subr.bf16.mxu0 %v2184_v28  ;;  %v2236_v17 = vld [vmem:[#allocation13 + $0x110] ss:$8 sps:$4 sm:$0xff]   ;;  %v2241_v32 = vld [vmem:[#allocation13 + $0x104] ss:$8 sps:$4 sm:$0xff]   ;;  %v2239_v2 = vld [vmem:[#allocation13 + $0x100] ss:$8 sps:$4 sm:$0xff]  }
 0x181   :  { %v653_v5 = vmax.f32 %v633_v15, 0.0  ;;  %1214 = vmatpush1.bf16.msra.mxu0 %v2182_v42 }
 0x182   :  { %1215 = vmatprep.subr.bf16.mxu0 %v2187_v43 }
 0x183   :  { %v665_v7 = vmax.f32 %v653_v5, %v655_v35  ;;  %v1848_v35 = vld [vmem:[#allocation11] ss:$0 sm:$0xff] }
 0x185   :  { %v670_v39 = vpack.c.bf16 %v665_v7, %v664_v38  ;;  %1216 = vmatpush1.bf16.msra.mxu0 %v2185_v44 }
 0x186   :  { %1217 = vmatprep.subr.bf16.mxu0 %v2190_v45 }
 0x187   :  { %684 = vrot.lane.b32.xlu0 %v670_v39, %s2476_s18 }
 0x189   :  { %1218 = vmatpush1.bf16.msra.mxu0 %v2188_v46 }
 0x18a   :  { %1219 = vmatprep.subr.bf16.mxu0 %v2193_v8 }
 0x18d   :  { %1220 = vmatpush1.bf16.msra.mxu0 %v2191_v31 }
 0x18e   :  { %1221 = vmatprep.subr.bf16.mxu0 %v2199_v10 }
 0x191   :  { %1222 = vmatpush2.bf16.msra.mxu0 %v2197_v41  ;;  %v2243_v41 = vld [vmem:[%s2944_s9 + $0x38] sm:$0xff]  }
 0x192   :  { %1223 = vmatprep.subr.bf16.mxu0 %v2202_v56  ;;  %v2249_v56 = vld [vmem:[%s2944_s9 + $0x28] sm:$0xff]  }
 0x195   :  { %1224 = vmatpush2.bf16.msra.mxu0 %v2200_v57 }
 0x196   :  { %1225 = vmatprep.subr.bf16.mxu0 %v2208_v58 }
 0x1d9   :  { %v677_v48 = vpop.permute.xlu0 %676 }
 0x1da   :  { %1863 = vmatmul.mubr.msk.bf16.vlgmr.msra.gmra.mxu1 %vm1862_vm4, %v677_v48  ;;  %v2244_v48 = vld [vmem:[%s2944_s9 + $0x70] sm:$0xff]  }
 0x1db   :  { %1864 = vmatprep.mubr.msk.bf16.mxu1 %vm686_vm3, %v2757_v55  ;;  %1259 = vmatpush1.bf16.msra.mxu1 %v2194_v47 }
 0x1dc   :  { %1260 = vmatprep.subr.bf16.mxu1 %v2205_v13 }
 0x1e1   :  { %v679_v49 = vpop.permute.xlu0 %678 }
 0x1e2   :  { %v692_v50 = vsel %vm686_vm3, %v2733_v62, %v679_v49 }
 0x1e3   :  { %861 = vmatmul.mubr.bf16.gmra.mxu1 %v692_v50  ;;  %v2245_v50 = vld [vmem:[%s2944_s9 + $0x30] sm:$0xff]  }
 0x1e4   :  { %1865 = vmatprep.mubr.msk.bf16.mxu1 %vm686_vm3, %v2769_v4 }
 0x1e9   :  { %v681_v51 = vpop.permute.xlu1 %680 }
 0x1ea   :  { %v696_v52 = vsel %vm686_vm3, %v2743_v36, %v681_v51  ;;  %v2203_v36 = vld [vmem:[#allocation13 + $0x160] ss:$8 sps:$4 sm:$0xff]  }
 0x1eb   :  { %869 = vmatmul.mubr.bf16.gmra.mxu1 %v696_v52  ;;  %v2247_v52 = vld [vmem:[%s2944_s9 + $0x68] sm:$0xff]  }
 0x1ec   :  { %1866 = vmatprep.mubr.msk.bf16.mxu1 %vm686_vm3, %v670_v39  ;;  %1261 = vmatpush1.bf16.msra.mxu1 %v2203_v36 }
 0x1ed   :  { %1262 = vmatprep.subr.bf16.mxu1 %v2211_v60 }
 0x1f0   :  { %1263 = vmatpush1.bf16.msra.mxu1 %v2209_v59 }
 0x1f1   :  { %v683_v54 = vpop.permute.xlu1 %682  ;;  %1264 = vmatprep.subr.bf16.mxu1 %v2217_v20 }
 0x1f2   :  { %v700_v11 = vsel %vm686_vm3, %v2757_v55, %v683_v54  ;;  %v2206_v55 = vld [vmem:[#allocation13 + $0xd0] ss:$8 sps:$4 sm:$0xff]  }
 0x1f3   :  { %877 = vmatmul.mubr.bf16.gmra.mxu1 %v700_v11  ;;  %1226 = vmatpush2.bf16.msra.mxu0 %v2206_v55 }
 0x1f4   :  { %884 = vmatprep.mubr.bf16.mxu1 %v2486_v0  ;;  %1227 = vmatprep.subr.bf16.mxu0 %v2214_v61 }
 0x1f5   :  { %1265 = vmatpush1.bf16.msra.mxu1 %v2215_v9 }
 0x1f6   :  { %1266 = vmatprep.subr.bf16.mxu1 %v2223_v22  ;;  %v2251_v22 = vld [vmem:[%s2944_s9 + $0x60] sm:$0xff]  }
 0x1f7   :  { %1228 = vmatpush2.bf16.msra.mxu0 %v2212_v63 }
 0x1f8   :  { %1229 = vmatprep.subr.bf16.mxu0 %v2220_v3 }
 0x1f9   :  { %v685_v53 = vpop.permute.xlu0 %684  ;;  %1267 = vmatpush1.bf16.msra.mxu1 %v2221_v14  ;;  %v2250_v14 = vld [vmem:[%s2945_s10 + $0x70] sm:$0xff]  }
 0x1fa   :  { %v704_v62 = vsel %vm686_vm3, %v2769_v4, %v685_v53  ;;  %1268 = vmatprep.subr.bf16.mxu1 %v2232_v26  ;;  %v2242_v4 = vld [vmem:[%s2944_s9 + $0x78] sm:$0xff]   ;;  %v2256_v26 = vld [vmem:[%s2945_s10 + $0x28] sm:$0xff]  }
 0x1fb   :  { %885 = vmatmul.mubr.bf16.gmra.mxu1 %v704_v62  ;;  %1230 = vmatpush2.bf16.msra.mxu0 %v2218_v6 }
 0x1fc   :  { %1290 = vmatprep.mubr.bf16.mxu1 %v2486_v0  ;;  %1231 = vmatprep.subr.bf16.mxu0 %v2226_v1  ;;  %v2248_v1 = vld [vmem:[%s2945_s10 + $0x38] sm:$0xff]  }
 0x1fd   :  { %1269 = vmatpush1.bf16.msra.mxu1 %v2230_v25  ;;  %v2255_v25 = vld [vmem:[%s2944_s9 + $0x58] sm:$0xff]  }
 0x1fe   :  { %1270 = vmatprep.subr.bf16.mxu1 %v2238_v30  ;;  %v2259_v30 = vld [vmem:[%s2944_s9 + $0x50] sm:$0xff]  }
 0x1ff   :  { %1232 = vmatpush2.bf16.msra.mxu0 %v2224_v21 }
 0x200   :  { %1233 = vmatprep.subr.bf16.mxu0 %v2229_v16  ;;  %v2252_v16 = vld [vmem:[%s2945_s10 + $0x30] sm:$0xff]  }
 0x201   :  { %1271 = vmatpush1.bf16.msra.mxu1 %v2236_v17  ;;  %v2260_v17 = vld [vmem:[%s2945_s10 + $0x20] sm:$0xff]  }
 0x202   :  { %1272 = vmatprep.subr.bf16.mxu1 %v2241_v32  ;;  %v2261_v32 = vld [vmem:[%s2944_s9 + $0x10] sm:$0xff]  }
 0x203   :  { %1234 = vmatpush2.bf16.msra.mxu0 %v2227_v24  ;;  %v2253_v24 = vld [vmem:[%s2944_s9 + $0x20] sm:$0xff]  }
 0x204   :  { %1235 = vmatprep.subr.bf16.mxu0 %v2235_v27  ;;  %v2257_v27 = vld [vmem:[%s2944_s9 + $0x18] sm:$0xff]  }
 0x205   :  { %1273 = vmatpush1.bf16.msra.mxu1 %v2239_v2  ;;  %v2262_v2 = vld [vmem:[%s2945_s10 + $0x58] sm:$0xff]  }
 0x206   :  { %1999 = vmatprep.subr.bf16.mxu1 %v2246_v19  ;;  %v2264_v19 = vld [vmem:[%s2945_s10 + $0x18] sm:$0xff]  }
 0x207   :  { %1236 = vmatpush2.bf16.msra.mxu0 %v2233_v29  ;;  %v2258_v29 = vld [vmem:[%s2945_s10 + $0x60] sm:$0xff]  }
 0x208   :  { %2021 = vmatprep.subr.bf16.mxu0 %v2242_v4  ;;  %v2263_v4 = vld [vmem:[%s2944_s9 + $0x48] sm:$0xff]  }
 0x29a   :  { %v854_v12 = vpop.f32.mrf.mxu1 }
 0x29b   :  { %v855_v38 = vadd.f32 %v1848_v35, %v854_v12  ;;  %v2265_v12 = vld [vmem:[%s2944_s9 + $0x8] sm:$0xff]  }
 0x29c   :  { %v856_v15 = vpop.f32.mrf.mxu1 }
 0x29d   :  { %v891_v42 = vmax.f32 %v855_v38, 0.0  ;;  %v2266_v15 = vld [vmem:[%s2945_s10 + $0x50] sm:$0xff]   ;;  %v2273_v38 = vld [vmem:[%s2945_s10] sm:$0xff]  }
 0x29e   :  { %v857_v33 = vpop.f32.mrf.mxu1 }
 0x29f   :  { %v858_v7 = vadd.f32 %v1848_v35, %v857_v33  ;;  %v2267_v33 = vld [vmem:[%s2944_s9 + $0x40] sm:$0xff]  }
 0x2a0   :  { %v859_v34 = vpop.f32.mrf.mxu1 }
 0x2a1   :  { %v892_v43 = vmax.f32 %v858_v7, 0.0  ;;  %v2268_v34 = vld [vmem:[%s2945_s10 + $0x10] sm:$0xff]   ;;  %v2488_v7 = vmov 0.0  }
 0x2a3   :  { %v862_v5 = vpop.f32.mrf.mxu1 }
 0x2a4   :  { %v863_v18 = vadd.f32 %v1848_v35, %v862_v5  ;;  %v2270_v5 = vld [vmem:[%s2945_s10 + $0x48] sm:$0xff]  }
 0x2a5   :  { %v864_v37 = vpop.f32.mrf.mxu1 }
 0x2a6   :  { %v893_v39 = vmax.f32 %v863_v18, 0.0  ;;  %v2271_v18 = vld [vmem:[%s2945_s10 + $0x8] sm:$0xff]   ;;  %v2272_v37 = vld [vmem:[%s2945_s10 + $0x40] sm:$0xff]  }
 0x2a7   :  { %v865_v23 = vpop.f32.mrf.mxu1 }
 0x2a8   :  { %v866_v40 = vadd.f32 %v1848_v35, %v865_v23  ;;  %v899_v46 = vmax.f32 %v891_v42, %v893_v39  ;;  %v955_v39 = vlaneseq }
 0x2a9   :  { %v867_v28 = vpop.f32.mrf.mxu1 }
 0x2aa   :  { %v894_v44 = vmax.f32 %v866_v40, 0.0  ;;  %v956_v28 = vshrl.u32 %v955_v39, 7 }
 0x2ab   :  { %v870_v45 = vpop.f32.mrf.mxu1 }
 0x2ac   :  { %v900_v8 = vmax.f32 %v892_v43, %v894_v44  ;;  %v871_v53 = vadd.f32 %v1848_v35, %v870_v45  ;;  %v957_v43 = vsub.s32 0, %v956_v28  ;;  %v953_v44 = vld [vmem:[%s2943_s8] sm:$0x3]  ;;  %v961_v45 = vsub.s32 1, %v956_v28 }
 0x2ad   :  { %v872_v31 = vpop.f32.mrf.mxu1 }
 0x2ae   :  { %v903_v10 = vpack.c.bf16 %v900_v8, %v899_v46  ;;  %v895_v55 = vmax.f32 %v871_v53, 0.0  ;;  %v958_v8 = vrot.slane %v953_v44, %v957_v43  ;;  %v962_v31 = vrot.slane %v953_v44, %v961_v45  ;;  %v1947_v44 = vld [vmem:[#allocation14] ss:$0 sm:$0xff] }
 0x2af   :  { %v873_v47 = vpop.f32.mrf.mxu1 }
 0x2b0   :  { %1237 = vmatprep.mubr.bf16.mxu0 %v903_v10  ;;  %v874_v62 = vadd.f32 %v1848_v35, %v873_v47 }
 0x2b1   :  { %v875_v49 = vpop.f32.mrf.mxu1  ;;  %1238 = vmatmul.mubr.bf16.vlgmr.msra.gmra.mxu0 %v2486_v0 }
 0x2b2   :  { %2022 = vmatpush3.bf16.msra.mxu0 %v2243_v41  ;;  %v896_v59 = vmax.f32 %v874_v62, 0.0 }
 0x2b3   :  { %v878_v51 = vpop.f32.mrf.mxu1  ;;  %2023 = vmatprep.subr.bf16.mxu0 %v2244_v48 }
 0x2b4   :  { %v879_v54 = vadd.f32 %v1848_v35, %v878_v51 }
 0x2b5   :  { %v880_v11 = vpop.f32.mrf.mxu1 }
 0x2b6   :  { %2024 = vmatpush3.bf16.msra.mxu0 %v2245_v50  ;;  %v897_v36 = vmax.f32 %v879_v54, 0.0 }
 0x2b7   :  { %v881_v57 = vpop.f32.mrf.mxu1  ;;  %2025 = vmatprep.subr.bf16.mxu0 %v2247_v52 }
 0x2b8   :  { %v882_v13 = vadd.f32 %v1848_v35, %v881_v57  ;;  %v901_v63 = vmax.f32 %v895_v55, %v897_v36  ;;  %v2269_v35 = vld [vmem:[%s2944_s9] sm:$0xff]  }
 0x2b9   :  { %v883_v58 = vpop.f32.mrf.mxu1 }
 0x2ba   :  { %v898_v60 = vmax.f32 %v882_v13, 0.0  ;;  %2026 = vmatpush3.bf16.msra.mxu0 %v2249_v56 }
 0x2bb   :  { %v886_v61 = vpop.f32.mrf.mxu1  ;;  %2027 = vmatprep.subr.bf16.mxu0 %v2251_v22 }
 0x2bc   :  { %v902_v3 = vmax.f32 %v896_v59, %v898_v60 }
 0x2bd   :  { %v887_v6 = vpop.f32.mrf.mxu1 }
 0x2be   :  { %v904_v20 = vpack.c.bf16 %v902_v3, %v901_v63  ;;  %2028 = vmatpush3.bf16.msra.mxu0 %v2253_v24 }
 0x2bf   :  { %v888_v9 = vpop.f32.mrf.mxu1  ;;  %2029 = vmatprep.subr.bf16.mxu0 %v2255_v25 }
 0x2c0   :  { %1247 = vmatprep.mubr.bf16.mxu0 %v904_v20  ;;  %1291 = vmatmul.mubr.bf16.vlgmr.msra.gmra.mxu1 %v904_v20 }
 0x2c1   :  { %v889_v21 = vpop.f32.mrf.mxu1  ;;  %1248 = vmatmul.mubr.bf16.gmra.mxu0 %v903_v10  ;;  %1300 = vmatprep.mubr.bf16.mxu1 %v2486_v0 }
 0x2c2   :  { %2000 = vmatpush3.bf16.msra.mxu1 %v2248_v1  ;;  %2030 = vmatpush3.bf16.msra.mxu0 %v2257_v27 }
 0x2c3   :  { %2001 = vmatprep.subr.bf16.mxu1 %v2250_v14  ;;  %2031 = vmatprep.subr.bf16.mxu0 %v2259_v30 }
 0x2c6   :  { %2002 = vmatpush3.bf16.msra.mxu1 %v2252_v16  ;;  %2032 = vmatpush3.bf16.msra.mxu0 %v2261_v32  ;;  %v2274_v32 = vld [vmem:[%s2947_s12 + $0x38] sm:$0xff]  }
 0x2c7   :  { %2033 = vmatprep.subr.bf16.mxu0 %v2263_v4  ;;  %v2275_v4 = vld [vmem:[%s2947_s12 + $0x30] sm:$0xff]  }
 0x2c8   :  { %1301 = vmatmul.mubr.bf16.gmra.mxu1 %v2486_v0  ;;  %v2254_v0 = vld [vmem:[%s2945_s10 + $0x68] sm:$0xff]  }
 0x2c9   :  { %2003 = vmatprep.subr.bf16.mxu1 %v2254_v0 }
 0x2ca   :  { %2004 = vmatpush3.bf16.msra.mxu1 %v2256_v26  ;;  %2034 = vmatpush3.bf16.msra.mxu0 %v2265_v12  ;;  %v2277_v12 = vld [vmem:[%s2947_s12 + $0x20] sm:$0xff]  }
 0x2cb   :  { %2005 = vmatprep.subr.bf16.mxu1 %v2258_v29  ;;  %2035 = vmatprep.subr.bf16.mxu0 %v2267_v33  ;;  %v2279_v33 = vld [vmem:[%s2947_s12 + $0x10] sm:$0xff]  }
 0x2ce   :  { %2006 = vmatpush3.bf16.msra.mxu1 %v2260_v17  ;;  %2036 = vmatpush3.bf16.msra.mxu0 %v2269_v35  ;;  %v2281_v35 = vld [vmem:[%s2947_s12] sm:$0xff]  }
 0x2cf   :  { %2007 = vmatprep.subr.bf16.mxu1 %v2262_v2 }
 0x2d2   :  { %2008 = vmatpush3.bf16.msra.mxu1 %v2264_v19  ;;  %v2276_v19 = vld [vmem:[%s2947_s12 + $0x28] sm:$0xff]  }
 0x2d3   :  { %2009 = vmatprep.subr.bf16.mxu1 %v2266_v15  ;;  %v2278_v15 = vld [vmem:[%s2947_s12 + $0x18] sm:$0xff]  }
 0x2d6   :  { %2010 = vmatpush3.bf16.msra.mxu1 %v2268_v34  ;;  %v2280_v34 = vld [vmem:[%s2947_s12 + $0x8] sm:$0xff]  }
 0x2d7   :  { %2011 = vmatprep.subr.bf16.mxu1 %v2270_v5 }
 0x2da   :  { %2012 = vmatpush3.bf16.msra.mxu1 %v2271_v18 }
 0x2db   :  { %2013 = vmatprep.subr.bf16.mxu1 %v2272_v37 }
 0x2de   :  { %2014 = vmatpush3.bf16.msra.mxu1 %v2273_v38 }
 0x2df   :  { %2118 = vmatprep.subr.bf16.mxu1 %v2488_v7 }
 0x371   :  { %v1239_v23 = vpop.f32.mrf.mxu0 }
 0x372   :  { %v1240_v47 = vadd.f32 %v1239_v23, %v958_v8 }
 0x373   :  { %v1241_v40 = vpop.f32.mrf.mxu0 }
 0x374   :  { %v1242_v49 = vadd.f32 %v1241_v40, %v962_v31 }
 0x375   :  { %v1243_v42 = vpop.f32.mrf.mxu0 }
 0x376   :  { %v1244_v50 = vadd.f32 %v1243_v42, %v958_v8 }
 0x377   :  { %v1245_v46 = vpop.f32.mrf.mxu0 }
 0x378   :  { %v1246_v54 = vadd.f32 %v1245_v46, %v962_v31 }
 0x380   :  { %v1292_v10 = vpop.f32.mrf.mxu1 }
 0x381   :  { %v1249_v41 = vpop.f32.mrf.mxu0  ;;  %v1293_v62 = vadd.f32 %v1292_v10, %v1240_v47 }
 0x382   :  { %v1294_v48 = vpop.f32.mrf.mxu1  ;;  %v1250_v1 = vadd.f32 %v1249_v41, %v958_v8 }
 0x383   :  { %v1251_v51 = vpop.f32.mrf.mxu0  ;;  %v1295_v11 = vadd.f32 %v1294_v48, %v1242_v49  ;;  %v1311_v60 = vmax.f32 %v1293_v62, 0.0 }
 0x384   :  { %v1296_v52 = vpop.f32.mrf.mxu1  ;;  %v1252_v3 = vadd.f32 %v1251_v51, %v962_v31 }
 0x385   :  { %v1297_v53 = vadd.f32 %v1296_v52, %v1244_v50  ;;  %v1253_v56 = vpop.f32.mrf.mxu0  ;;  %v1312_v55 = vmax.f32 %v1295_v11, 0.0  ;;  %v1948_v50 = vld [vmem:[%s2948_s13] ss:$0 sm:$0xff] }
 0x386   :  { %v1298_v57 = vpop.f32.mrf.mxu1  ;;  %v1254_v6 = vadd.f32 %v1253_v56, %v958_v8 }
 0x387   :  { %v1299_v36 = vadd.f32 %v1298_v57, %v1246_v54  ;;  %v1313_v13 = vmax.f32 %v1297_v53, 0.0  ;;  %v1255_v61 = vpop.f32.mrf.mxu0 }
 0x388   :  { %v1302_v58 = vpop.f32.mrf.mxu1  ;;  %v1256_v14 = vadd.f32 %v1255_v61, %v962_v31 }
 0x389   :  { %v1314_v59 = vmax.f32 %v1299_v36, 0.0  ;;  %v1319_v9 = vpack.c.bf16 %v1313_v13, %v1311_v60  ;;  %v1303_v24 = vadd.f32 %v1302_v58, %v1250_v1 }
 0x38a   :  { %v1304_v63 = vpop.f32.mrf.mxu1 }
 0x38b   :  { %v1320_v20 = vpack.c.bf16 %v1314_v59, %v1312_v55  ;;  %v1305_v22 = vadd.f32 %v1304_v63, %v1252_v3  ;;  %v1315_v30 = vmax.f32 %v1303_v24, 0.0 }
 0x38c   :  { %v1306_v21 = vpop.f32.mrf.mxu1 }
 0x38d   :  { %v1307_v16 = vadd.f32 %v1306_v21, %v1254_v6  ;;  %1652 = vmatprep.mubr.bf16.mxu0 %v1320_v20  ;;  %v1316_v27 = vmax.f32 %v1305_v22, 0.0 }
 0x38e   :  { %v1308_v0 = vpop.f32.mrf.mxu1  ;;  %1653 = vmatmul.mubr.bf16.vlgmr.msra.gmra.mxu0 %v1319_v9 }
 0x38f   :  { %v1309_v25 = vadd.f32 %v1308_v0, %v1256_v14  ;;  %v1317_v26 = vmax.f32 %v1307_v16, 0.0 }
 0x391   :  { %v1318_v29 = vmax.f32 %v1309_v25, 0.0  ;;  %v1353_v2 = vpack.c.bf16 %v1317_v26, %v1315_v30 }
 0x393   :  { %v1354_v17 = vpack.c.bf16 %v1318_v29, %v1316_v27 }
 0x395   :  { %1515 = vmatprep.mubr.bf16.mxu1 %v1354_v17 }
 0x396   :  { %1516 = vmatmul.mubr.bf16.vlgmr.msra.gmra.mxu1 %v1353_v2 }
 0x397   :  { %2119 = vmatpush3.bf16.msra.mxu1 %v2274_v32  ;;  %2134 = vmatprep.mubr.msk.bf16.mxu1 %vm2489_vm5, %v2488_v7 }
 0x398   :  { %2120 = vmatprep.subr.bf16.mxu1 %v2488_v7 }
 0x39b   :  { %2121 = vmatpush3.bf16.msra.mxu1 %v2275_v4 }
 0x39c   :  { %2122 = vmatprep.subr.bf16.mxu1 %v2488_v7 }
 0x39f   :  { %2123 = vmatpush3.bf16.msra.mxu1 %v2276_v19 }
 0x3a0   :  { %2124 = vmatprep.subr.bf16.mxu1 %v2488_v7 }
 0x3a3   :  { %2125 = vmatpush3.bf16.msra.mxu1 %v2277_v12 }
 0x3a4   :  { %2126 = vmatprep.subr.bf16.mxu1 %v2488_v7 }
 0x3a7   :  { %2127 = vmatpush3.bf16.msra.mxu1 %v2278_v15 }
 0x3a8   :  { %2128 = vmatprep.subr.bf16.mxu1 %v2488_v7 }
 0x3ab   :  { %2129 = vmatpush3.bf16.msra.mxu1 %v2279_v33 }
 0x3ac   :  { %2130 = vmatprep.subr.bf16.mxu1 %v2488_v7 }
 0x3af   :  { %2131 = vmatpush3.bf16.msra.mxu1 %v2280_v34 }
 0x3b0   :  { %2132 = vmatprep.subr.bf16.mxu1 %v2488_v7 }
 0x3b3   :  { %2133 = vmatpush3.bf16.msra.mxu1 %v2281_v35 }
 0x44e   :  { %v2037_v5 = vpop.f32.mrf.mxu0 }
 0x450   :  { %v2038_v18 = vpop.f32.mrf.mxu0 }
 0x451   :  { %v2039_v39 = vadd.f32 %v2038_v18, %v2037_v5 }
 0x452   :  { %v2040_v37 = vpop.f32.mrf.mxu0 }
 0x454   :  { %v2041_v28 = vpop.f32.mrf.mxu0 }
 0x455   :  { %v2042_v46 = vadd.f32 %v2041_v28, %v2040_v37 }
 0x456   :  { %v2015_v38 = vpop.f32.mrf.mxu1 }
 0x458   :  { %v2016_v23 = vpop.f32.mrf.mxu1 }
 0x459   :  { %v2017_v40 = vadd.f32 %v2016_v23, %v2015_v38 }
 0x45a   :  { %v2018_v42 = vpop.f32.mrf.mxu1 }
 0x45b   :  { %v1655_v43 = vadd.f32 %v2039_v39, %v2017_v40 }
 0x45c   :  { %v2019_v45 = vpop.f32.mrf.mxu1 }
 0x45d   :  { %v2020_v8 = vadd.f32 %v2019_v45, %v2018_v42  ;;  %v1668_v31 = vadd.f32 %v1947_v44, %v1655_v43 }
 0x45f   :  { %v1658_v10 = vadd.f32 %v2042_v46, %v2020_v8  ;;  %v1670_v47 = vmax.f32 %v1668_v31, 0.0 }
 0x461   :  { %v1669_v41 = vadd.f32 %v1947_v44, %v1658_v10 }
 0x463   :  { %v1671_v48 = vmax.f32 %v1669_v41, 0.0 }
 0x465   :  { %v1672_v7 = vpack.c.bf16 %v1671_v48, %v1670_v47 }
 0x467   :  { %2135 = vmatmul.mubr.bf16.vlgmr.msra.gmra.mxu1 %v1672_v7 }
 0x527   :  { %v1778_v49 = vpop.f32.mrf.mxu1 }
 0x528   :  { %v1779_v54 = vadd.f32 %v1948_v50, %v1778_v49 }
 0x529   :  { %v2136_v51 = vpop.f32.mrf.mxu1 }
 0x52b   :  { %v1781_v52 = vpop.f32.mrf.mxu1 }
 0x52c   :  { %v1782_v11 = vadd.f32 %v1948_v50, %v1781_v52 }
 0x52d   :  { %v2137_v53 = vpop.f32.mrf.mxu1 }
 0x52e   :  { %v1964_v62 = vpack.c.bf16 %v1782_v11, %v1779_v54 }
 0x530   :  { %1965 = vst [vmem:[#allocation16] sm:$0xff] %v1964_v62  }
 0x531   :  { %2453 = shalt.err (!%p2450_p2)
}
 0x532   :  { %1806 = dma.vmem_to_hbm [thread:$0]  %s1801_s27, 128, %s2949_s14, [#allocation4], %s2476_s18, %s2476_s18, %s2477_s19  }
 0x533   :  { %2472 = dma.done.wait [#allocation4], 128  }
 0x534   :  { %2473 = vsyncadd [#allocation4], 4294967168 }
 0x535   :  { %1810 = vsyncpa [#allocation3], 1 }
 0x536   :  { %1811 = vsyncpa [#allocation6], 1 }
 0x537   :  { %1812 = vsyncpa [#allocation9], 1 }
 0x538   :  { %1813 = vsyncpa [#allocation12], 1 }
 0x539   :  { %1814 = vsyncpa [#allocation15], 1 }
 0x53a   :  { %1815 = vsyncpa [#allocation4], 1 }

</bundles_post_ra>
